<compile_context>
chip_gen: v5e
topology: v5e:2x2
jax: 0.10.0
libtpu: 0.0.40
codegen_flags: <defaults>
</compile_context>

<pallas_src>
import functools

import jax
import jax.numpy as jnp
from jax.experimental import pallas as pl
from jax.experimental.pallas import tpu as pltpu

IN_DIM = 32 * 32 * 3   # 3072
H1 = 120
H2 = 84
H1_PAD = 128           # 120 -> 128 (lane/MXU aligned)
H2_PAD = 128           # 84  -> 128
OUT_DIM = 10


# ------------------------------- kernel ------------------------------------

def mlp_kernel(x_ref, w1_ref, b1_ref, w2_ref, b2_ref, w3_ref, b3_ref, o_ref,
               *, return_logits):
    # In-VMEM cast (no-op if the caller already streams bf16): avoids a
    # separate wrapper-side cast pass over HBM on the dominant x stream.
    x = x_ref[...].astype(jnp.bfloat16)                          # (TB, 3072)

    # fc1 + ReLU: bf16 x bf16 on the MXU, f32 accumulation.
    h1 = jnp.dot(x, w1_ref[...], preferred_element_type=jnp.float32)
    h1 = jnp.maximum(h1 + b1_ref[...], 0.0)                      # f32 (TB, 128)

    # fc2 + ReLU
    h2 = jnp.dot(h1.astype(jnp.bfloat16), w2_ref[...],
                 preferred_element_type=jnp.float32)
    h2 = jnp.maximum(h2 + b2_ref[...], 0.0)                      # f32 (TB, 128)

    # fc3 (zero-padded K rows contribute nothing)
    logits = jnp.dot(h2.astype(jnp.bfloat16), w3_ref[...],
                     preferred_element_type=jnp.float32) + b3_ref[...]

    if return_logits:
        o_ref[...] = logits
    else:
        # Numerically stable softmax over the 10 real classes (f32 math;
        # the reciprocal goes to the EUP slot, which has plenty of slack).
        m = jnp.max(logits, axis=-1, keepdims=True)
        e = jnp.exp(logits - m)
        denom = jnp.sum(e, axis=-1, keepdims=True)
        o_ref[...] = e * pl.reciprocal(denom, approx=True)


# --------------------------- tiling selection -------------------------------

def _round_up(v, m):
    return (v + m - 1) // m * m


def _vmem_capacity_bytes():
    try:
        return int(pltpu.get_tpu_info().vmem_capacity_bytes)
    except Exception:
        return 64 * 1024 * 1024      # assume the smallest (v7x-class) VMEM


def _choose_tiling(B, x_itemsize):
    """Pick the batch tile TB and the scoped-VMEM limit per TPU generation."""
    vmem = _vmem_capacity_bytes()
    if vmem >= 128 * 1024 * 1024:    # v5e / v6e: 128 MiB physical VMEM
        vmem_limit = 64 * 1024 * 1024
        hard_cap = 4096
    else:                            # v7x: 64 MiB per TensorCore
        vmem_limit = 44 * 1024 * 1024
        hard_cap = 2048
    # Budget for the double-buffered x tiles, leaving a reserve for the
    # resident weights, h1/h2 intermediates, output buffers and scratch.
    budget = vmem_limit - 12 * 1024 * 1024
    max_tb = budget // (2 * IN_DIM * x_itemsize)
    max_tb = min(hard_cap, max(256, (max_tb // 512) * 512))
    if B <= 8:
        tb = B                       # single tile covering a tiny batch
    else:
        # Guarantee >= 4 grid steps so the "parallel" batch axis can be
        # sharded across both v7x TensorCores (harmless on 1-TC chips).
        tb = min(max_tb, max(8, _round_up(pl.cdiv(B, 4), 8)))
    return tb, vmem_limit


# ------------------------------- wrapper ------------------------------------

_SINGLE_BUFFER_OK = True   # flips to False if pipeline_mode=Buffered(1) is rejected


def _resident_spec(shape, single_buffer):
    # Weights/biases: same block every grid step -> stay resident in VMEM.
    if single_buffer:
        return pl.BlockSpec(shape, lambda i: (0, 0),
                            pipeline_mode=pl.Buffered(1))
    return pl.BlockSpec(shape, lambda i: (0, 0))


def _forward(x_flat, params, return_logits, single_buffer):
    B = x_flat.shape[0]
    w1, b1, w2, b2, w3, b3 = params
    TB, vmem_limit = _choose_tiling(B, x_flat.dtype.itemsize)
    grid = (pl.cdiv(B, TB),)

    flops = 2 * B * (IN_DIM * H1_PAD + H1_PAD * H2_PAD + H2_PAD * OUT_DIM)
    bytes_accessed = (
        x_flat.size * x_flat.dtype.itemsize
        + (w1.size + w2.size + w3.size) * 2
        + (b1.size + b2.size + b3.size) * 4
        + B * OUT_DIM * 4
    )
    cost = pl.CostEstimate(
        flops=flops,
        transcendentals=0 if return_logits else B * (OUT_DIM + 1),
        bytes_accessed=bytes_accessed,
    )

    kernel = functools.partial(mlp_kernel, return_logits=return_logits)

    return pl.pallas_call(
        kernel,
        out_shape=jax.ShapeDtypeStruct((B, OUT_DIM), jnp.float32),
        grid=grid,
        in_specs=[
            pl.BlockSpec((TB, IN_DIM), lambda i: (i, 0)),      # streamed x tiles
            _resident_spec((IN_DIM, H1_PAD), single_buffer),   # w1
            _resident_spec((1, H1_PAD), single_buffer),        # b1
            _resident_spec((H1_PAD, H2_PAD), single_buffer),   # w2
            _resident_spec((1, H2_PAD), single_buffer),        # b2
            _resident_spec((H2_PAD, OUT_DIM), single_buffer),  # w3
            _resident_spec((1, OUT_DIM), single_buffer),       # b3
        ],
        out_specs=pl.BlockSpec((TB, OUT_DIM), lambda i: (i, 0)),
        compiler_params=pltpu.CompilerParams(
            dimension_semantics=("parallel",),
            vmem_limit_bytes=vmem_limit,
        ),
        cost_estimate=cost,
    )(x_flat, w1, b1, w2, b2, w3, b3)


def mlp_net_forward(x, params, return_logits=False):
    """x: (B, 3, 32, 32) NCHW, float32 or bfloat16. params: see prepare_params()."""
    global _SINGLE_BUFFER_OK
    B = x.shape[0]
    x_flat = x.reshape(B, -1)        # torch.flatten(x, 1); dtype left untouched
    if _SINGLE_BUFFER_OK:
        try:
            return _forward(x_flat, params, return_logits, single_buffer=True)
        except Exception:
            # This JAX build rejected pipeline_mode=pl.Buffered(1); fall back
            # to default double-buffering (only costs ~1 MiB of VMEM).
            _SINGLE_BUFFER_OK = False
    return _forward(x_flat, params, return_logits, single_buffer=False)


# ----------------------------- parameters -----------------------------------

def xavier_uniform(key, fan_in, fan_out):
    # Matches torch.nn.init.xavier_uniform_ on an (out, in) weight; stored
    # transposed (in, out) so the kernel computes x @ W.
    bound = (6.0 / (fan_in + fan_out)) ** 0.5
    return jax.random.uniform(
        key, (fan_in, fan_out), dtype=jnp.float32, minval=-bound, maxval=bound
    )


def init_params_f32(key):
    k1, k2, k3 = jax.random.split(key, 3)
    w1 = xavier_uniform(k1, IN_DIM, H1)
    b1 = jnp.full((1, H1), 0.01, dtype=jnp.float32)
    w2 = xavier_uniform(k2, H1, H2)
    b2 = jnp.full((1, H2), 0.01, dtype=jnp.float32)
    w3 = xavier_uniform(k3, H2, OUT_DIM)
    b3 = jnp.full((1, OUT_DIM), 0.01, dtype=jnp.float32)
    return (w1, b1, w2, b2, w3, b3)


def prepare_params(params_f32):
    """Zero-pad hidden dims 120->128 / 84->128, weights in bf16, biases in f32."""
    w1, b1, w2, b2, w3, b3 = params_f32
    w1p = jnp.zeros((IN_DIM, H1_PAD), jnp.float32).at[:, :H1].set(w1)
    b1p = jnp.zeros((1, H1_PAD), jnp.float32).at[:, :H1].set(b1)
    w2p = jnp.zeros((H1_PAD, H2_PAD), jnp.float32).at[:H1, :H2].set(w2)
    b2p = jnp.zeros((1, H2_PAD), jnp.float32).at[:, :H2].set(b2)
    w3p = jnp.zeros((H2_PAD, OUT_DIM), jnp.float32).at[:H2, :].set(w3)
    return (w1p.astype(jnp.bfloat16), b1p,
            w2p.astype(jnp.bfloat16), b2p,
            w3p.astype(jnp.bfloat16), b3)


# ----------------------------- references -----------------------------------

def reference_forward_matched(x, prepared, return_logits=False):
    """Pure-JAX reference with identical bf16/f32 mixed precision."""
    w1, b1, w2, b2, w3, b3 = prepared
    h = x.reshape(x.shape[0], -1).astype(jnp.bfloat16)
    h = jnp.maximum(jnp.dot(h, w1, preferred_element_type=jnp.float32) + b1, 0.0)
    h = jnp.maximum(jnp.dot(h.astype(jnp.bfloat16), w2,
                            preferred_element_type=jnp.float32) + b2, 0.0)
    logits = jnp.dot(h.astype(jnp.bfloat16), w3,
                     preferred_element_type=jnp.float32) + b3
    return logits if return_logits else jax.nn.softmax(logits, axis=1)


def reference_forward_f32(x, params_f32):
    """Full-precision, unpadded reference (the original PyTorch math)."""
    w1, b1, w2, b2, w3, b3 = params_f32
    h = x.reshape(x.shape[0], -1)
    h = jnp.maximum(h @ w1 + b1, 0.0)
    h = jnp.maximum(h @ w2 + b2, 0.0)
    return jax.nn.softmax(h @ w3 + b3, axis=1)


# -------------------------------- demo --------------------------------------

if __name__ == "__main__":
    key = jax.random.PRNGKey(0)
    k_params, k_x = jax.random.split(key)

    params_f32 = init_params_f32(k_params)
    params = prepare_params(params_f32)

    # Small deterministic input, NCHW f32 (as the PyTorch module receives it).
    x = jax.random.normal(k_x, (2, 3, 32, 32), dtype=jnp.float32)

    # softmax path (module default)
    out = jax.block_until_ready(mlp_net_forward(x, params))
    assert out.shape == (2, OUT_DIM)

    ref_matched = reference_forward_matched(x, params)
    ref_f32 = reference_forward_f32(x, params_f32)
    assert jnp.allclose(out, ref_matched, atol=5e-3, rtol=5e-3), "mismatch vs bf16 reference"
    assert jnp.allclose(out, ref_f32, atol=3e-2, rtol=3e-2), "mismatch vs f32 reference"
    assert jnp.allclose(jnp.sum(out, axis=1), 1.0, atol=5e-3), "softmax rows must sum to 1"

    # return_logits=True path
    logits = jax.block_until_ready(mlp_net_forward(x, params, return_logits=True))
    ref_logits = reference_forward_matched(x, params, return_logits=True)
    assert logits.shape == (2, OUT_DIM)
    assert jnp.allclose(logits, ref_logits, atol=5e-3, rtol=5e-3)

    # Multi-step grid with a partial last tile (B=20 -> TB=8, 3 steps).
    xb = jax.random.normal(jax.random.PRNGKey(1), (20, 3, 32, 32), dtype=jnp.float32)
    out_b = jax.block_until_ready(mlp_net_forward(xb, params))
    ref_b = reference_forward_matched(xb, params)
    assert out_b.shape == (20, OUT_DIM)
    assert jnp.allclose(out_b, ref_b, atol=5e-3, rtol=5e-3)

    # bf16-ingest path (no wrapper cast pass; kernel cast is a no-op).
    out_bf16_in = jax.block_until_ready(mlp_net_forward(xb.astype(jnp.bfloat16), params))
    assert jnp.allclose(out_bf16_in, ref_b, atol=5e-3, rtol=5e-3)

    print("KERNEL_OK")
</pallas_src>

<mosaic_0001>
module attributes {stable_mosaic.version = 11 : i64} {
  func.func @mlp_kernel(%arg0: i32, %arg1: memref<2x3072xf32, #tpu.memory_space<vmem>>, %arg2: memref<3072x128xbf16, #tpu.memory_space<vmem>>, %arg3: memref<1x128xf32, #tpu.memory_space<vmem>>, %arg4: memref<128x128xbf16, #tpu.memory_space<vmem>>, %arg5: memref<1x128xf32, #tpu.memory_space<vmem>>, %arg6: memref<128x10xbf16, #tpu.memory_space<vmem>>, %arg7: memref<1x10xf32, #tpu.memory_space<vmem>>, %arg8: memref<2x10xf32, #tpu.memory_space<vmem>>) attributes {dimension_semantics = [#tpu.dimension_semantics<parallel>], iteration_bounds = array<i64: 1>, scalar_prefetch = 0 : i64, scratch_operands = 0 : i64, tpu.core_type = #tpu.core_type<tc>, window_params = [{transform_indices = @transform_0, window_bounds = array<i64: 2, 3072>}, {pipeline_mode = #tpu.pipeline_mode<synchronous>, transform_indices = @transform_1, window_bounds = array<i64: 3072, 128>}, {pipeline_mode = #tpu.pipeline_mode<synchronous>, transform_indices = @transform_2, window_bounds = array<i64: 1, 128>}, {pipeline_mode = #tpu.pipeline_mode<synchronous>, transform_indices = @transform_3, window_bounds = array<i64: 128, 128>}, {pipeline_mode = #tpu.pipeline_mode<synchronous>, transform_indices = @transform_4, window_bounds = array<i64: 1, 128>}, {pipeline_mode = #tpu.pipeline_mode<synchronous>, transform_indices = @transform_5, window_bounds = array<i64: 128, 10>}, {pipeline_mode = #tpu.pipeline_mode<synchronous>, transform_indices = @transform_6, window_bounds = array<i64: 1, 10>}, {transform_indices = @transform_7, window_bounds = array<i64: 2, 10>}]} {
    %c0 = arith.constant 0 : index
    %c0_0 = arith.constant 0 : index
    %0 = vector.load %arg1[%c0, %c0_0] : memref<2x3072xf32, #tpu.memory_space<vmem>>, vector<2x3072xf32>
    %1 = arith.truncf %0 : vector<2x3072xf32> to vector<2x3072xbf16>
    %c0_1 = arith.constant 0 : index
    %c0_2 = arith.constant 0 : index
    %2 = vector.load %arg2[%c0_1, %c0_2] : memref<3072x128xbf16, #tpu.memory_space<vmem>>, vector<3072x128xbf16>
    %cst = arith.constant dense<0.000000e+00> : vector<2x128xf32>
    %3 = tpu.matmul %1, %2, %cst {dimension_numbers = #tpu.dot_dimension_numbers<[1], [0], [0], [1], [0, 0, 1, 1], [], []>} : vector<2x3072xbf16>, vector<3072x128xbf16>, vector<2x128xf32> -> vector<2x128xf32>
    %c0_3 = arith.constant 0 : index
    %c0_4 = arith.constant 0 : index
    %4 = vector.load %arg3[%c0_3, %c0_4] : memref<1x128xf32, #tpu.memory_space<vmem>>, vector<1x128xf32>
    %5 = vector.broadcast %4 : vector<1x128xf32> to vector<2x128xf32>
    %6 = arith.addf %3, %5 : vector<2x128xf32>
    %cst_5 = arith.constant 0.000000e+00 : f32
    %7 = vector.broadcast %cst_5 : f32 to vector<2x128xf32>
    %8 = arith.maximumf %6, %7 : vector<2x128xf32>
    %9 = arith.truncf %8 : vector<2x128xf32> to vector<2x128xbf16>
    %c0_6 = arith.constant 0 : index
    %c0_7 = arith.constant 0 : index
    %10 = vector.load %arg4[%c0_6, %c0_7] : memref<128x128xbf16, #tpu.memory_space<vmem>>, vector<128x128xbf16>
    %cst_8 = arith.constant dense<0.000000e+00> : vector<2x128xf32>
    %11 = tpu.matmul %9, %10, %cst_8 {dimension_numbers = #tpu.dot_dimension_numbers<[1], [0], [0], [1], [0, 0, 1, 1], [], []>} : vector<2x128xbf16>, vector<128x128xbf16>, vector<2x128xf32> -> vector<2x128xf32>
    %c0_9 = arith.constant 0 : index
    %c0_10 = arith.constant 0 : index
    %12 = vector.load %arg5[%c0_9, %c0_10] : memref<1x128xf32, #tpu.memory_space<vmem>>, vector<1x128xf32>
    %13 = vector.broadcast %12 : vector<1x128xf32> to vector<2x128xf32>
    %14 = arith.addf %11, %13 : vector<2x128xf32>
    %cst_11 = arith.constant 0.000000e+00 : f32
    %15 = vector.broadcast %cst_11 : f32 to vector<2x128xf32>
    %16 = arith.maximumf %14, %15 : vector<2x128xf32>
    %17 = arith.truncf %16 : vector<2x128xf32> to vector<2x128xbf16>
    %c0_12 = arith.constant 0 : index
    %c0_13 = arith.constant 0 : index
    %18 = vector.load %arg6[%c0_12, %c0_13] : memref<128x10xbf16, #tpu.memory_space<vmem>>, vector<128x10xbf16>
    %cst_14 = arith.constant dense<0.000000e+00> : vector<2x10xf32>
    %19 = tpu.matmul %17, %18, %cst_14 {dimension_numbers = #tpu.dot_dimension_numbers<[1], [0], [0], [1], [0, 0, 1, 1], [], []>} : vector<2x128xbf16>, vector<128x10xbf16>, vector<2x10xf32> -> vector<2x10xf32>
    %c0_15 = arith.constant 0 : index
    %c0_16 = arith.constant 0 : index
    %20 = vector.load %arg7[%c0_15, %c0_16] : memref<1x10xf32, #tpu.memory_space<vmem>>, vector<1x10xf32>
    %21 = vector.broadcast %20 : vector<1x10xf32> to vector<2x10xf32>
    %22 = arith.addf %19, %21 : vector<2x10xf32>
    %cst_17 = arith.constant dense<0xFF800000> : vector<2xf32>
    %23 = vector.multi_reduction <maximumf>, %22, %cst_17 [1] : vector<2x10xf32> to vector<2xf32>
    %24 = vector.shape_cast %23 : vector<2xf32> to vector<2x1xf32>
    %25 = vector.broadcast %24 : vector<2x1xf32> to vector<2x10xf32>
    %26 = arith.subf %22, %25 : vector<2x10xf32>
    %27 = math.exp %26 : vector<2x10xf32>
    %cst_18 = arith.constant dense<0.000000e+00> : vector<2xf32>
    %28 = vector.multi_reduction <add>, %27, %cst_18 [1] : vector<2x10xf32> to vector<2xf32>
    %29 = vector.shape_cast %28 : vector<2xf32> to vector<2x1xf32>
    %30 = tpu.reciprocal %29 {approx = true} : vector<2x1xf32> -> vector<2x1xf32>
    %31 = vector.broadcast %30 : vector<2x1xf32> to vector<2x10xf32>
    %32 = arith.mulf %27, %31 : vector<2x10xf32>
    %c0_19 = arith.constant 0 : index
    %c0_20 = arith.constant 0 : index
    %33 = vector.load %arg8[%c0_19, %c0_20] : memref<2x10xf32, #tpu.memory_space<vmem>>, vector<2x10xf32>
    tpu.vector_store %arg8[%c0_19, %c0_20], %32 {strides = array<i32>} : memref<2x10xf32, #tpu.memory_space<vmem>>, vector<2x10xf32>,
    return
  }
  func.func @transform_0(%arg0: i32) -> (i32, i32) {
    %c0_i32 = arith.constant 0 : i32
    %c0_i32_0 = arith.constant 0 : i32
    return %arg0, %c0_i32 : i32, i32
  }
  func.func @transform_1(%arg0: i32) -> (i32, i32) {
    %c0_i32 = arith.constant 0 : i32
    %c0_i32_0 = arith.constant 0 : i32
    %c0_i32_1 = arith.constant 0 : i32
    return %c0_i32, %c0_i32_0 : i32, i32
  }
  func.func @transform_2(%arg0: i32) -> (i32, i32) {
    %c0_i32 = arith.constant 0 : i32
    %c0_i32_0 = arith.constant 0 : i32
    %c0_i32_1 = arith.constant 0 : i32
    return %c0_i32, %c0_i32_0 : i32, i32
  }
  func.func @transform_3(%arg0: i32) -> (i32, i32) {
    %c0_i32 = arith.constant 0 : i32
    %c0_i32_0 = arith.constant 0 : i32
    %c0_i32_1 = arith.constant 0 : i32
    return %c0_i32, %c0_i32_0 : i32, i32
  }
  func.func @transform_4(%arg0: i32) -> (i32, i32) {
    %c0_i32 = arith.constant 0 : i32
    %c0_i32_0 = arith.constant 0 : i32
    %c0_i32_1 = arith.constant 0 : i32
    return %c0_i32, %c0_i32_0 : i32, i32
  }
  func.func @transform_5(%arg0: i32) -> (i32, i32) {
    %c0_i32 = arith.constant 0 : i32
    %c0_i32_0 = arith.constant 0 : i32
    %c0_i32_1 = arith.constant 0 : i32
    return %c0_i32, %c0_i32_0 : i32, i32
  }
  func.func @transform_6(%arg0: i32) -> (i32, i32) {
    %c0_i32 = arith.constant 0 : i32
    %c0_i32_0 = arith.constant 0 : i32
    %c0_i32_1 = arith.constant 0 : i32
    return %c0_i32, %c0_i32_0 : i32, i32
  }
  func.func @transform_7(%arg0: i32) -> (i32, i32) {
    %c0_i32 = arith.constant 0 : i32
    %c0_i32_0 = arith.constant 0 : i32
    return %arg0, %c0_i32 : i32, i32
  }
}

module attributes {stable_mosaic.version = 11 : i64} {
  func.func @mlp_kernel(%arg0: i32, %arg1: memref<2x3072xf32, #tpu.memory_space<vmem>>, %arg2: memref<3072x128xbf16, #tpu.memory_space<vmem>>, %arg3: memref<1x128xf32, #tpu.memory_space<vmem>>, %arg4: memref<128x128xbf16, #tpu.memory_space<vmem>>, %arg5: memref<1x128xf32, #tpu.memory_space<vmem>>, %arg6: memref<128x10xbf16, #tpu.memory_space<vmem>>, %arg7: memref<1x10xf32, #tpu.memory_space<vmem>>, %arg8: memref<2x10xf32, #tpu.memory_space<vmem>>) attributes {dimension_semantics = [#tpu.dimension_semantics<parallel>], iteration_bounds = array<i64: 1>, scalar_prefetch = 0 : i64, scratch_operands = 0 : i64, tpu.core_type = #tpu.core_type<tc>, window_params = [{transform_indices = @transform_0, window_bounds = array<i64: 2, 3072>}, {pipeline_mode = #tpu.pipeline_mode<synchronous>, transform_indices = @transform_1, window_bounds = array<i64: 3072, 128>}, {pipeline_mode = #tpu.pipeline_mode<synchronous>, transform_indices = @transform_2, window_bounds = array<i64: 1, 128>}, {pipeline_mode = #tpu.pipeline_mode<synchronous>, transform_indices = @transform_3, window_bounds = array<i64: 128, 128>}, {pipeline_mode = #tpu.pipeline_mode<synchronous>, transform_indices = @transform_4, window_bounds = array<i64: 1, 128>}, {pipeline_mode = #tpu.pipeline_mode<synchronous>, transform_indices = @transform_5, window_bounds = array<i64: 128, 10>}, {pipeline_mode = #tpu.pipeline_mode<synchronous>, transform_indices = @transform_6, window_bounds = array<i64: 1, 10>}, {transform_indices = @transform_7, window_bounds = array<i64: 2, 10>}]} {
    %c0 = arith.constant 0 : index
    %c0_0 = arith.constant 0 : index
    %0 = vector.load %arg1[%c0, %c0_0] : memref<2x3072xf32, #tpu.memory_space<vmem>>, vector<2x3072xf32>
    %1 = arith.truncf %0 : vector<2x3072xf32> to vector<2x3072xbf16>
    %c0_1 = arith.constant 0 : index
    %c0_2 = arith.constant 0 : index
    %2 = vector.load %arg2[%c0_1, %c0_2] : memref<3072x128xbf16, #tpu.memory_space<vmem>>, vector<3072x128xbf16>
    %cst = arith.constant dense<0.000000e+00> : vector<2x128xf32>
    %3 = tpu.matmul %1, %2, %cst {dimension_numbers = #tpu.dot_dimension_numbers<[1], [0], [0], [1], [0, 0, 1, 1], [], []>} : vector<2x3072xbf16>, vector<3072x128xbf16>, vector<2x128xf32> -> vector<2x128xf32>
    %c0_3 = arith.constant 0 : index
    %c0_4 = arith.constant 0 : index
    %4 = vector.load %arg3[%c0_3, %c0_4] : memref<1x128xf32, #tpu.memory_space<vmem>>, vector<1x128xf32>
    %5 = vector.broadcast %4 : vector<1x128xf32> to vector<2x128xf32>
    %6 = arith.addf %3, %5 : vector<2x128xf32>
    %cst_5 = arith.constant 0.000000e+00 : f32
    %7 = vector.broadcast %cst_5 : f32 to vector<2x128xf32>
    %8 = arith.maximumf %6, %7 : vector<2x128xf32>
    %9 = arith.truncf %8 : vector<2x128xf32> to vector<2x128xbf16>
    %c0_6 = arith.constant 0 : index
    %c0_7 = arith.constant 0 : index
    %10 = vector.load %arg4[%c0_6, %c0_7] : memref<128x128xbf16, #tpu.memory_space<vmem>>, vector<128x128xbf16>
    %cst_8 = arith.constant dense<0.000000e+00> : vector<2x128xf32>
    %11 = tpu.matmul %9, %10, %cst_8 {dimension_numbers = #tpu.dot_dimension_numbers<[1], [0], [0], [1], [0, 0, 1, 1], [], []>} : vector<2x128xbf16>, vector<128x128xbf16>, vector<2x128xf32> -> vector<2x128xf32>
    %c0_9 = arith.constant 0 : index
    %c0_10 = arith.constant 0 : index
    %12 = vector.load %arg5[%c0_9, %c0_10] : memref<1x128xf32, #tpu.memory_space<vmem>>, vector<1x128xf32>
    %13 = vector.broadcast %12 : vector<1x128xf32> to vector<2x128xf32>
    %14 = arith.addf %11, %13 : vector<2x128xf32>
    %cst_11 = arith.constant 0.000000e+00 : f32
    %15 = vector.broadcast %cst_11 : f32 to vector<2x128xf32>
    %16 = arith.maximumf %14, %15 : vector<2x128xf32>
    %17 = arith.truncf %16 : vector<2x128xf32> to vector<2x128xbf16>
    %c0_12 = arith.constant 0 : index
    %c0_13 = arith.constant 0 : index
    %18 = vector.load %arg6[%c0_12, %c0_13] : memref<128x10xbf16, #tpu.memory_space<vmem>>, vector<128x10xbf16>
    %cst_14 = arith.constant dense<0.000000e+00> : vector<2x10xf32>
    %19 = tpu.matmul %17, %18, %cst_14 {dimension_numbers = #tpu.dot_dimension_numbers<[1], [0], [0], [1], [0, 0, 1, 1], [], []>} : vector<2x128xbf16>, vector<128x10xbf16>, vector<2x10xf32> -> vector<2x10xf32>
    %c0_15 = arith.constant 0 : index
    %c0_16 = arith.constant 0 : index
    %20 = vector.load %arg7[%c0_15, %c0_16] : memref<1x10xf32, #tpu.memory_space<vmem>>, vector<1x10xf32>
    %21 = vector.broadcast %20 : vector<1x10xf32> to vector<2x10xf32>
    %22 = arith.addf %19, %21 : vector<2x10xf32>
    %cst_17 = arith.constant dense<0xFF800000> : vector<2xf32>
    %23 = vector.multi_reduction <maximumf>, %22, %cst_17 [1] : vector<2x10xf32> to vector<2xf32>
    %24 = vector.shape_cast %23 : vector<2xf32> to vector<2x1xf32>
    %25 = vector.broadcast %24 : vector<2x1xf32> to vector<2x10xf32>
    %26 = arith.subf %22, %25 : vector<2x10xf32>
    %27 = math.exp %26 : vector<2x10xf32>
    %cst_18 = arith.constant dense<0.000000e+00> : vector<2xf32>
    %28 = vector.multi_reduction <add>, %27, %cst_18 [1] : vector<2x10xf32> to vector<2xf32>
    %29 = vector.shape_cast %28 : vector<2xf32> to vector<2x1xf32>
    %30 = tpu.reciprocal %29 {approx = true} : vector<2x1xf32> -> vector<2x1xf32>
    %31 = vector.broadcast %30 : vector<2x1xf32> to vector<2x10xf32>
    %32 = arith.mulf %27, %31 : vector<2x10xf32>
    %c0_19 = arith.constant 0 : index
    %c0_20 = arith.constant 0 : index
    %33 = vector.load %arg8[%c0_19, %c0_20] : memref<2x10xf32, #tpu.memory_space<vmem>>, vector<2x10xf32>
    tpu.vector_store %arg8[%c0_19, %c0_20], %32 {strides = array<i32>} : memref<2x10xf32, #tpu.memory_space<vmem>>, vector<2x10xf32>,
    return
  }
  func.func @transform_0(%arg0: i32) -> (i32, i32) {
    %c0_i32 = arith.constant 0 : i32
    %c0_i32_0 = arith.constant 0 : i32
    return %arg0, %c0_i32 : i32, i32
  }
  func.func @transform_1(%arg0: i32) -> (i32, i32) {
    %c0_i32 = arith.constant 0 : i32
    %c0_i32_0 = arith.constant 0 : i32
    %c0_i32_1 = arith.constant 0 : i32
    return %c0_i32, %c0_i32_0 : i32, i32
  }
  func.func @transform_2(%arg0: i32) -> (i32, i32) {
    %c0_i32 = arith.constant 0 : i32
    %c0_i32_0 = arith.constant 0 : i32
    %c0_i32_1 = arith.constant 0 : i32
    return %c0_i32, %c0_i32_0 : i32, i32
  }
  func.func @transform_3(%arg0: i32) -> (i32, i32) {
    %c0_i32 = arith.constant 0 : i32
    %c0_i32_0 = arith.constant 0 : i32
    %c0_i32_1 = arith.constant 0 : i32
    return %c0_i32, %c0_i32_0 : i32, i32
  }
  func.func @transform_4(%arg0: i32) -> (i32, i32) {
    %c0_i32 = arith.constant 0 : i32
    %c0_i32_0 = arith.constant 0 : i32
    %c0_i32_1 = arith.constant 0 : i32
    return %c0_i32, %c0_i32_0 : i32, i32
  }
  func.func @transform_5(%arg0: i32) -> (i32, i32) {
    %c0_i32 = arith.constant 0 : i32
    %c0_i32_0 = arith.constant 0 : i32
    %c0_i32_1 = arith.constant 0 : i32
    return %c0_i32, %c0_i32_0 : i32, i32
  }
  func.func @transform_6(%arg0: i32) -> (i32, i32) {
    %c0_i32 = arith.constant 0 : i32
    %c0_i32_0 = arith.constant 0 : i32
    %c0_i32_1 = arith.constant 0 : i32
    return %c0_i32, %c0_i32_0 : i32, i32
  }
  func.func @transform_7(%arg0: i32) -> (i32, i32) {
    %c0_i32 = arith.constant 0 : i32
    %c0_i32_0 = arith.constant 0 : i32
    return %arg0, %c0_i32 : i32, i32
  }
}

</mosaic_0001>

<bundles_post_ra>
// kernel: tpu_custom_call.1
= control target key start
LH: loop header
LB: loop body
LE: loop exit
PB: predicated region body
PF: predicated region fallthrough
CT: control target
= control target key end

     0   :  { %12 = vsyncpa [#allocation3], 0  ;;  %s3489_s0 = inlined_call_operand.hbm [shape: f32[2,3072], index: 0, kind: input, shape index: {}]   ;;  %s3490_s1 = inlined_call_operand.hbm [shape: bf16[3072,128], index: 1, kind: input, shape index: {}]   ;;  %s3491_s2 = inlined_call_operand.vmem [shape: f32[1,128], index: 2, kind: input, shape index: {}]   ;;  %s3492_s3 = inlined_call_operand.vmem [shape: bf16[128,128], index: 3, kind: input, shape index: {}]   ;;  %s3493_s4 = inlined_call_operand.vmem [shape: f32[1,128], index: 4, kind: input, shape index: {}]   ;;  %s3494_s5 = inlined_call_operand.vmem [shape: bf16[128,10], index: 5, kind: input, shape index: {}]   ;;  %s3495_s6 = inlined_call_operand.vmem [shape: f32[1,10], index: 6, kind: input, shape index: {}]   ;;  %s3496_s7 = inlined_call_operand.hbm [shape: f32[2,10], index: 7, kind: output, shape index: {}]  }
   0x1   :  { %13 = vsyncpa [#allocation6], 0 }
   0x2   :  { %14 = vsyncpa [#allocation4], 0  ;;  %s20_s26 = sshll.u32 %s3489_s0, 4  ;;  %s3327_s27 = smov [#allocation2]   ;;  %s21_s26 = int_to_ptr.hbm [resolvable:$true] %s20_s26 }
   0x3   :  { %s22_s28 = sshll.u32 %s3327_s27, 4  ;;  %s30_s8 = sshll.u32 %s3490_s1, 4  ;;  %s23_s28 = int_to_ptr.vmem [resolvable:$true] %s22_s28  ;;  %s31_s8 = int_to_ptr.hbm [resolvable:$true] %s30_s8 }
   0x4   :  { %25 = dma.hbm_to_vmem [thread:$0]  %s21_s26, 768, %s23_s28, [#allocation3]  }
   0x5   :  { %s3328_s9 = smov [#allocation5]   ;;  %s3329_s11 = smov 64  }
   0x6   :  { %s32_s10 = sshll.u32 %s3328_s9, 4  ;;  %s3330_s12 = smov 4   ;;  %s33_s10 = int_to_ptr.vmem [resolvable:$true] %s32_s10 }
   0x7   :  { %38 = dma.hbm_to_vmem [thread:$0]  %s31_s8, 24576, %s33_s10, [#allocation6], %s3329_s11, %s3329_s11, %s3330_s12  }
   0x8   :  { %3321 = dma.done.wait [#allocation3], 768  }
   0x9   :  { %3322 = vsyncadd [#allocation3], 4294966528 }
   0xa   :  { %3323 = dma.done.wait [#allocation6], 24576  }
   0xb   :  { %3324 = vsyncadd [#allocation6], 4294942720  ;;  %v3036_v0 = vld [vmem:[#allocation5 + $0x38] sm:$0xff]  ;;  %v3035_v4 = vld [vmem:[#allocation5 + $0x30] sm:$0xff]  ;;  %vm2166_vm0 = vcmask 74752   ;;  %s2186_s22 = sshll.u32 %s3496_s7, 4  ;;  %s2187_s22 = int_to_ptr.hbm [resolvable:$true] %s2186_s22 }
   0xc   :  { %v3044_v1 = vld [vmem:[#allocation5 + $0x78] sm:$0xff]  ;;  %1688 = vmatpush.bf16.msra.mxu0 %v3036_v0  ;;  %v3043_v5 = vld [vmem:[#allocation5 + $0x70] sm:$0xff]  ;;  %v3034_v8 = vld [vmem:[#allocation5 + $0x28] sm:$0xff] }
   0xd   :  { %v3052_v2 = vld [vmem:[#allocation5 + $0xb8] sm:$0xff]  ;;  %1701 = vmatpush.bf16.msra.mxu1 %v3044_v1  ;;  %v3051_v6 = vld [vmem:[#allocation5 + $0xb0] sm:$0xff]  ;;  %v3042_v9 = vld [vmem:[#allocation5 + $0x68] sm:$0xff] }
   0xe   :  { %v3060_v3 = vld [vmem:[#allocation5 + $0xf8] sm:$0xff]  ;;  %1714 = vmatpush.bf16.msra.mxu2 %v3052_v2  ;;  %v3059_v7 = vld [vmem:[#allocation5 + $0xf0] sm:$0xff]  ;;  %v3050_v10 = vld [vmem:[#allocation5 + $0xa8] sm:$0xff] }
   0xf   :  { %1727 = vmatpush.bf16.msra.mxu3 %v3060_v3  ;;  %v3058_v11 = vld [vmem:[#allocation5 + $0xe8] sm:$0xff]  ;;  %v3033_v12 = vld [vmem:[#allocation5 + $0x20] sm:$0xff]  ;;  %v3032_v16 = vld [vmem:[#allocation5 + $0x18] sm:$0xff] }
  0x10   :  { %1689 = vmatpush.bf16.msra.mxu0 %v3035_v4  ;;  %v3041_v13 = vld [vmem:[#allocation5 + $0x60] sm:$0xff]  ;;  %v3040_v17 = vld [vmem:[#allocation5 + $0x58] sm:$0xff]  ;;  %v3031_v20 = vld [vmem:[#allocation5 + $0x10] sm:$0xff] }
  0x11   :  { %1702 = vmatpush.bf16.msra.mxu1 %v3043_v5  ;;  %v3049_v14 = vld [vmem:[#allocation5 + $0xa0] sm:$0xff]  ;;  %v3048_v18 = vld [vmem:[#allocation5 + $0x98] sm:$0xff]  ;;  %v3039_v21 = vld [vmem:[#allocation5 + $0x50] sm:$0xff] }
  0x12   :  { %1715 = vmatpush.bf16.msra.mxu2 %v3051_v6  ;;  %v3057_v15 = vld [vmem:[#allocation5 + $0xe0] sm:$0xff]  ;;  %v3056_v19 = vld [vmem:[#allocation5 + $0xd8] sm:$0xff]  ;;  %v57_v22 = vld [vmem:[#allocation2] sm:$0xff] }
  0x13   :  { %1728 = vmatpush.bf16.msra.mxu3 %v3059_v7  ;;  %69 = vst [vmem:[#allocation1] ss:$4 sm:$0xff] %v57_v22  ;;  %v3047_v23 = vld [vmem:[#allocation5 + $0x90] sm:$0xff]  ;;  %v3030_v25 = vld [vmem:[#allocation5 + $0x8] sm:$0xff]  ;;  %v3029_v29 = vld [vmem:[#allocation5] sm:$0xff] }
  0x14   :  { %1690 = vmatpush.bf16.msra.mxu0 %v3034_v8  ;;  %v3055_v24 = vld [vmem:[#allocation5 + $0xd0] sm:$0xff]  ;;  %v3038_v26 = vld [vmem:[#allocation5 + $0x48] sm:$0xff]  ;;  %v3037_v30 = vld [vmem:[#allocation5 + $0x40] sm:$0xff] }
  0x15   :  { %1703 = vmatpush.bf16.msra.mxu1 %v3042_v9  ;;  %v3046_v27 = vld [vmem:[#allocation5 + $0x88] sm:$0xff]  ;;  %v3045_v31 = vld [vmem:[#allocation5 + $0x80] sm:$0xff]  ;;  %v3068_v38 = vld [vmem:[#allocation5 + $0x138] sm:$0xff] }
  0x16   :  { %1716 = vmatpush.bf16.msra.mxu2 %v3050_v10  ;;  %v3054_v28 = vld [vmem:[#allocation5 + $0xc8] sm:$0xff]  ;;  %v3053_v33 = vld [vmem:[#allocation5 + $0xc0] sm:$0xff]  ;;  %v3076_v39 = vld [vmem:[#allocation5 + $0x178] sm:$0xff] }
  0x17   :  { %1729 = vmatpush.bf16.msra.mxu3 %v3058_v11  ;;  %v59_v35 = vld [vmem:[#allocation2 + $0x10] sm:$0xff]  ;;  %v3084_v40 = vld [vmem:[#allocation5 + $0x1b8] sm:$0xff]  ;;  %v3067_v47 = vld [vmem:[#allocation5 + $0x130] sm:$0xff] }
  0x18   :  { %1691 = vmatpush.bf16.msra.mxu0 %v3033_v12  ;;  %v3092_v41 = vld [vmem:[#allocation5 + $0x1f8] sm:$0xff]  ;;  %v3075_v48 = vld [vmem:[#allocation5 + $0x170] sm:$0xff]  ;;  %v3066_v51 = vld [vmem:[#allocation5 + $0x128] sm:$0xff] }
  0x19   :  { %1704 = vmatpush.bf16.msra.mxu1 %v3041_v13  ;;  %v58_v42 = vld [vmem:[#allocation2 + $0x8] sm:$0xff]  ;;  %v3083_v49 = vld [vmem:[#allocation5 + $0x1b0] sm:$0xff]  ;;  %v3074_v52 = vld [vmem:[#allocation5 + $0x168] sm:$0xff] }
  0x1a   :  { %1717 = vmatpush.bf16.msra.mxu2 %v3049_v14  ;;  %v74_v32 = vld.sshfl [vmem:[#allocation1 + $0x10] sm:$0xff pattern:$0x73625140]  ;;  %v72_v34 = vld.sshfl [vmem:[#allocation1] sm:$0xff pattern:$0x73625140] }
  0x1b   :  { %1730 = vmatpush.bf16.msra.mxu3 %v3057_v15  ;;  %v75_v36 = vld.sshfl [vmem:[#allocation1 + $0x18] sm:$0xff pattern:$0x73625140]  ;;  %v73_v37 = vld.sshfl [vmem:[#allocation1 + $0x8] sm:$0xff pattern:$0x73625140]  ;;  %v126_v43 = vpack.c.bf16 %v74_v32, %v74_v32  ;;  %v124_v44 = vpack.c.bf16 %v72_v34, %v72_v34 }
  0x1c   :  { %1692 = vmatpush.bf16.msra.mxu0 %v3032_v16  ;;  %80 = vst [vmem:[#allocation1] ss:$4 sm:$0xff] %v59_v35  ;;  %v127_v45 = vpack.c.bf16 %v75_v36, %v75_v36  ;;  %v125_v46 = vpack.c.bf16 %v73_v37, %v73_v37  ;;  %v3091_v50 = vld [vmem:[#allocation5 + $0x1f0] sm:$0xff]  ;;  %v3082_v53 = vld [vmem:[#allocation5 + $0x1a8] sm:$0xff]  ;;  %v3065_v55 = vld [vmem:[#allocation5 + $0x120] sm:$0xff] }
  0x1d   :  { %1705 = vmatpush.bf16.msra.mxu1 %v3040_v17  ;;  %71 = vst [vmem:[#allocation1 + $0x20] ss:$4 sm:$0xff] %v58_v42  ;;  %v3090_v54 = vld [vmem:[#allocation5 + $0x1e8] sm:$0xff]  ;;  %v3073_v57 = vld [vmem:[#allocation5 + $0x160] sm:$0xff]  ;;  %v3064_v0 = vld [vmem:[#allocation5 + $0x118] sm:$0xff] }
  0x1e   :  { %1718 = vmatpush.bf16.msra.mxu2 %v3048_v18  ;;  %v60_v59 = vld [vmem:[#allocation2 + $0x18] sm:$0xff]  ;;  %v3081_v62 = vld [vmem:[#allocation5 + $0x1a0] sm:$0xff]  ;;  %v3072_v1 = vld [vmem:[#allocation5 + $0x158] sm:$0xff] }
  0x1f   :  { %1731 = vmatpush.bf16.msra.mxu3 %v3056_v19  ;;  %v3089_v63 = vld [vmem:[#allocation5 + $0x1e0] sm:$0xff]  ;;  %v3080_v2 = vld [vmem:[#allocation5 + $0x198] sm:$0xff]  ;;  %v3063_v4 = vld [vmem:[#allocation5 + $0x110] sm:$0xff] }
  0x20   :  { %1693 = vmatpush.bf16.msra.mxu0 %v3031_v20  ;;  %v3088_v3 = vld [vmem:[#allocation5 + $0x1d8] sm:$0xff]  ;;  %v3071_v5 = vld [vmem:[#allocation5 + $0x150] sm:$0xff]  ;;  %v3062_v8 = vld [vmem:[#allocation5 + $0x108] sm:$0xff] }
  0x21   :  { %1706 = vmatpush.bf16.msra.mxu1 %v3039_v21  ;;  %v3079_v6 = vld [vmem:[#allocation5 + $0x190] sm:$0xff]  ;;  %v3070_v9 = vld [vmem:[#allocation5 + $0x148] sm:$0xff]  ;;  %v3061_v12 = vld [vmem:[#allocation5 + $0x100] sm:$0xff] }
  0x22   :  { %1719 = vmatpush.bf16.msra.mxu2 %v3047_v23  ;;  %v3087_v7 = vld [vmem:[#allocation5 + $0x1d0] sm:$0xff]  ;;  %v3078_v10 = vld [vmem:[#allocation5 + $0x188] sm:$0xff]  ;;  %v3069_v13 = vld [vmem:[#allocation5 + $0x140] sm:$0xff] }
  0x23   :  { %1732 = vmatpush.bf16.msra.mxu3 %v3055_v24  ;;  %v3086_v11 = vld [vmem:[#allocation5 + $0x1c8] sm:$0xff]  ;;  %v3077_v14 = vld [vmem:[#allocation5 + $0x180] sm:$0xff]  ;;  %v3100_v16 = vld [vmem:[#allocation5 + $0x238] sm:$0xff] }
  0x24   :  { %1694 = vmatpush.bf16.msra.mxu0 %v3030_v25  ;;  %v3378_v56 = vld.sshfl [vmem:[#allocation1 + $0x30] sm:$0xff pattern:$0x73625140]  ;;  %v3380_v58 = vld.sshfl [vmem:[#allocation1 + $0x20] sm:$0xff pattern:$0x73625140] }
  0x25   :  { %1707 = vmatpush.bf16.msra.mxu1 %v3038_v26  ;;  %v3382_v60 = vld.sshfl [vmem:[#allocation1 + $0x38] sm:$0xff pattern:$0x73625140]  ;;  %v3384_v61 = vld.sshfl [vmem:[#allocation1 + $0x28] sm:$0xff pattern:$0x73625140]  ;;  %v130_v21 = vpack.c.bf16 %v3378_v56, %v3378_v56  ;;  %v128_v22 = vpack.c.bf16 %v3380_v58, %v3380_v58 }
  0x26   :  { %1720 = vmatpush.bf16.msra.mxu2 %v3046_v27  ;;  %81 = vst [vmem:[#allocation1 + $0x20] ss:$4 sm:$0xff] %v60_v59  ;;  %v3085_v15 = vld [vmem:[#allocation5 + $0x1c0] sm:$0xff]  ;;  %v3108_v17 = vld [vmem:[#allocation5 + $0x278] sm:$0xff]  ;;  %v3099_v20 = vld [vmem:[#allocation5 + $0x230] sm:$0xff]  ;;  %v131_v25 = vpack.c.bf16 %v3382_v60, %v3382_v60  ;;  %v129_v26 = vpack.c.bf16 %v3384_v61, %v3384_v61 }
  0x27   :  { %1733 = vmatpush.bf16.msra.mxu3 %v3054_v28  ;;  %v3116_v18 = vld [vmem:[#allocation5 + $0x2b8] sm:$0xff]  ;;  %v3107_v23 = vld [vmem:[#allocation5 + $0x270] sm:$0xff]  ;;  %v3394_v27 = vld.sshfl [vmem:[#allocation1] sm:$0xff pattern:$0x73625140] }
  0x28   :  { %1695 = vmatpush.bf16.msra.mxu0 %v3029_v29  ;;  %v3124_v19 = vld [vmem:[#allocation5 + $0x2f8] sm:$0xff]  ;;  %v3115_v24 = vld [vmem:[#allocation5 + $0x2b0] sm:$0xff]  ;;  %v3400_v32 = vld.sshfl [vmem:[#allocation1 + $0x18] sm:$0xff pattern:$0x73625140]  ;;  %v132_v61 = vpack.c.bf16 %v3394_v27, %v3394_v27 }
  0x29   :  { %1708 = vmatpush.bf16.msra.mxu1 %v3037_v30  ;;  %v3396_v28 = vld.sshfl [vmem:[#allocation1 + $0x10] sm:$0xff pattern:$0x73625140]  ;;  %v3398_v29 = vld.sshfl [vmem:[#allocation1 + $0x8] sm:$0xff pattern:$0x73625140] }
  0x2a   :  { %1721 = vmatpush.bf16.msra.mxu2 %v3045_v31  ;;  %v3123_v30 = vld [vmem:[#allocation5 + $0x2f0] sm:$0xff]  ;;  %v3106_v34 = vld [vmem:[#allocation5 + $0x268] sm:$0xff]  ;;  %v3097_v37 = vld [vmem:[#allocation5 + $0x220] sm:$0xff] }
  0x2b   :  { %1734 = vmatpush.bf16.msra.mxu3 %v3053_v33  ;;  %1696 = vmatmul.bf16.vlgmr.msra.gmra.mxu0 %v124_v44  ;;  %v61_v31 = vld [vmem:[#allocation2 + $0x20] sm:$0xff]  ;;  %v3098_v33 = vld [vmem:[#allocation5 + $0x228] sm:$0xff]  ;;  %v3104_v42 = vld [vmem:[#allocation5 + $0x258] sm:$0xff] }
  0x2c   :  { %1740 = vmatpush.bf16.msrb.mxu0 %v3068_v38  ;;  %1709 = vmatmul.bf16.vlgmr.msra.gmra.mxu1 %v125_v46  ;;  %90 = vst [vmem:[#allocation1] ss:$4 sm:$0xff] %v61_v31  ;;  %v3114_v35 = vld [vmem:[#allocation5 + $0x2a8] sm:$0xff]  ;;  %v3105_v38 = vld [vmem:[#allocation5 + $0x260] sm:$0xff]  ;;  %v3120_v44 = vld [vmem:[#allocation5 + $0x2d8] sm:$0xff] }
  0x2d   :  { %1753 = vmatpush.bf16.msrb.mxu1 %v3076_v39  ;;  %1722 = vmatmul.bf16.vlgmr.msra.gmra.mxu2 %v126_v43  ;;  %v3122_v36 = vld [vmem:[#allocation5 + $0x2e8] sm:$0xff]  ;;  %v3113_v39 = vld [vmem:[#allocation5 + $0x2a0] sm:$0xff]  ;;  %v3112_v43 = vld [vmem:[#allocation5 + $0x298] sm:$0xff] }
  0x2e   :  { %1766 = vmatpush.bf16.msrb.mxu2 %v3084_v40  ;;  %1735 = vmatmul.bf16.vlgmr.msra.gmra.mxu3 %v127_v45  ;;  %v3121_v40 = vld [vmem:[#allocation5 + $0x2e0] sm:$0xff]  ;;  %v3095_v45 = vld [vmem:[#allocation5 + $0x210] sm:$0xff]  ;;  %v3140_v58 = vld [vmem:[#allocation5 + $0x378] sm:$0xff] }
  0x2f   :  { %1779 = vmatpush.bf16.msrb.mxu3 %v3092_v41  ;;  %v3096_v41 = vld [vmem:[#allocation5 + $0x218] sm:$0xff]  ;;  %v3103_v46 = vld [vmem:[#allocation5 + $0x250] sm:$0xff]  ;;  %v3117_v56 = vld [vmem:[#allocation5 + $0x2c0] sm:$0xff] }
  0x30   :  { %1741 = vmatpush.bf16.msrb.mxu0 %v3067_v47  ;;  %v3111_v47 = vld [vmem:[#allocation5 + $0x290] sm:$0xff]  ;;  %v3148_v59 = vld [vmem:[#allocation5 + $0x3b8] sm:$0xff]  ;;  %v3134_v27 = vld [vmem:[#allocation5 + $0x348] sm:$0xff] }
  0x31   :  { %1754 = vmatpush.bf16.msrb.mxu1 %v3075_v48  ;;  %v3119_v48 = vld [vmem:[#allocation5 + $0x2d0] sm:$0xff]  ;;  %v3156_v60 = vld [vmem:[#allocation5 + $0x3f8] sm:$0xff]  ;;  %v3133_v31 = vld [vmem:[#allocation5 + $0x340] sm:$0xff] }
  0x32   :  { %1767 = vmatpush.bf16.msrb.mxu2 %v3083_v49  ;;  %v3094_v49 = vld [vmem:[#allocation5 + $0x208] sm:$0xff] }
  0x33   :  { %1780 = vmatpush.bf16.msrb.mxu3 %v3091_v50  ;;  %v3102_v50 = vld [vmem:[#allocation5 + $0x248] sm:$0xff] }
  0x34   :  { %1742 = vmatpush.bf16.msrb.mxu0 %v3066_v51  ;;  %v3110_v51 = vld [vmem:[#allocation5 + $0x288] sm:$0xff] }
  0x35   :  { %1755 = vmatpush.bf16.msrb.mxu1 %v3074_v52  ;;  %v3118_v52 = vld [vmem:[#allocation5 + $0x2c8] sm:$0xff] }
  0x36   :  { %1768 = vmatpush.bf16.msrb.mxu2 %v3082_v53  ;;  %v3093_v53 = vld [vmem:[#allocation5 + $0x200] sm:$0xff] }
  0x37   :  { %1781 = vmatpush.bf16.msrb.mxu3 %v3090_v54  ;;  %v3101_v54 = vld [vmem:[#allocation5 + $0x240] sm:$0xff] }
  0x38   :  { %1743 = vmatpush.bf16.msrb.mxu0 %v3065_v55  ;;  %v3109_v55 = vld [vmem:[#allocation5 + $0x280] sm:$0xff] }
  0x39   :  { %1756 = vmatpush.bf16.msrb.mxu1 %v3073_v57  ;;  %v3132_v57 = vld [vmem:[#allocation5 + $0x338] sm:$0xff] }
  0x3a   :  { %1769 = vmatpush.bf16.msrb.mxu2 %v3081_v62  ;;  %v134_v62 = vpack.c.bf16 %v3396_v28, %v3396_v28  ;;  %v3142_v28 = vld [vmem:[#allocation5 + $0x388] sm:$0xff] }
  0x3b   :  { %1782 = vmatpush.bf16.msrb.mxu3 %v3089_v63  ;;  %v3131_v63 = vld [vmem:[#allocation5 + $0x330] sm:$0xff] }
  0x3c   :  { %1744 = vmatpush.bf16.msrb.mxu0 %v3064_v0  ;;  %v133_v0 = vpack.c.bf16 %v3398_v29, %v3398_v29  ;;  %v3150_v29 = vld [vmem:[#allocation5 + $0x3c8] sm:$0xff] }
  0x3d   :  { %1757 = vmatpush.bf16.msrb.mxu1 %v3072_v1  ;;  %v135_v1 = vpack.c.bf16 %v3400_v32, %v3400_v32  ;;  %v3141_v32 = vld [vmem:[#allocation5 + $0x380] sm:$0xff] }
  0x3e   :  { %1770 = vmatpush.bf16.msrb.mxu2 %v3080_v2  ;;  %v3139_v2 = vld [vmem:[#allocation5 + $0x370] sm:$0xff] }
  0x3f   :  { %1783 = vmatpush.bf16.msrb.mxu3 %v3088_v3  ;;  %v3147_v3 = vld [vmem:[#allocation5 + $0x3b0] sm:$0xff] }
  0x40   :  { %1745 = vmatpush.bf16.msrb.mxu0 %v3063_v4  ;;  %v3410_v4 = vld.sshfl [vmem:[#allocation1 + $0x20] sm:$0xff pattern:$0x73625140] }
  0x41   :  { %1758 = vmatpush.bf16.msrb.mxu1 %v3071_v5  ;;  %v3412_v5 = vld.sshfl [vmem:[#allocation1 + $0x30] sm:$0xff pattern:$0x73625140] }
  0x42   :  { %1771 = vmatpush.bf16.msrb.mxu2 %v3079_v6  ;;  %v3414_v6 = vld.sshfl [vmem:[#allocation1 + $0x28] sm:$0xff pattern:$0x73625140] }
  0x43   :  { %1784 = vmatpush.bf16.msrb.mxu3 %v3087_v7  ;;  %v3155_v7 = vld [vmem:[#allocation5 + $0x3f0] sm:$0xff] }
  0x44   :  { %1746 = vmatpush.bf16.msrb.mxu0 %v3062_v8  ;;  %v62_v8 = vld [vmem:[#allocation2 + $0x28] sm:$0xff] }
  0x45   :  { %1759 = vmatpush.bf16.msrb.mxu1 %v3070_v9  ;;  %v3416_v9 = vld.sshfl [vmem:[#allocation1 + $0x38] sm:$0xff pattern:$0x73625140] }
  0x46   :  { %1772 = vmatpush.bf16.msrb.mxu2 %v3078_v10  ;;  %91 = vst [vmem:[#allocation1 + $0x20] ss:$4 sm:$0xff] %v62_v8  ;;  %v3130_v10 = vld [vmem:[#allocation5 + $0x328] sm:$0xff] }
  0x47   :  { %1785 = vmatpush.bf16.msrb.mxu3 %v3086_v11  ;;  %v3138_v11 = vld [vmem:[#allocation5 + $0x368] sm:$0xff] }
  0x48   :  { %1747 = vmatpush.bf16.msrb.mxu0 %v3061_v12  ;;  %v3146_v12 = vld [vmem:[#allocation5 + $0x3a8] sm:$0xff] }
  0x49   :  { %1760 = vmatpush.bf16.msrb.mxu1 %v3069_v13  ;;  %v3154_v13 = vld [vmem:[#allocation5 + $0x3e8] sm:$0xff] }
  0x4a   :  { %1773 = vmatpush.bf16.msrb.mxu2 %v3077_v14  ;;  %v3129_v14 = vld [vmem:[#allocation5 + $0x320] sm:$0xff]  ;;  %v92_v8 = vld.sshfl [vmem:[#allocation1] sm:$0xff pattern:$0x73625140] }
  0x4b   :  { %1786 = vmatpush.bf16.msrb.mxu3 %v3085_v15  ;;  %1748 = vmatmul.bf16.vlgmr.msrb.gmra.mxu0 %v128_v22  ;;  %v3137_v15 = vld [vmem:[#allocation5 + $0x360] sm:$0xff]  ;;  %v3127_v22 = vld [vmem:[#allocation5 + $0x310] sm:$0xff] }
  0x4c   :  { %1792 = vmatpush.bf16.msra.mxu0 %v3100_v16  ;;  %1761 = vmatmul.bf16.vlgmr.msrb.gmra.mxu1 %v129_v26  ;;  %v3145_v16 = vld [vmem:[#allocation5 + $0x3a0] sm:$0xff]  ;;  %v3126_v26 = vld [vmem:[#allocation5 + $0x308] sm:$0xff] }
  0x4d   :  { %1805 = vmatpush.bf16.msra.mxu1 %v3108_v17  ;;  %1774 = vmatmul.bf16.vlgmr.msrb.gmra.mxu2 %v130_v21  ;;  %v3153_v17 = vld [vmem:[#allocation5 + $0x3e0] sm:$0xff]  ;;  %v3152_v21 = vld [vmem:[#allocation5 + $0x3d8] sm:$0xff] }
  0x4e   :  { %1818 = vmatpush.bf16.msra.mxu2 %v3116_v18  ;;  %1787 = vmatmul.bf16.vlgmr.msrb.gmra.mxu3 %v131_v25  ;;  %v3128_v18 = vld [vmem:[#allocation5 + $0x318] sm:$0xff]  ;;  %v3151_v25 = vld [vmem:[#allocation5 + $0x3d0] sm:$0xff] }
  0x4f   :  { %1831 = vmatpush.bf16.msra.mxu3 %v3124_v19  ;;  %v3136_v19 = vld [vmem:[#allocation5 + $0x358] sm:$0xff] }
  0x50   :  { %1793 = vmatpush.bf16.msra.mxu0 %v3099_v20  ;;  %v3144_v20 = vld [vmem:[#allocation5 + $0x398] sm:$0xff] }
  0x51   :  { %1806 = vmatpush.bf16.msra.mxu1 %v3107_v23  ;;  %v3135_v23 = vld [vmem:[#allocation5 + $0x350] sm:$0xff] }
  0x52   :  { %1819 = vmatpush.bf16.msra.mxu2 %v3115_v24  ;;  %v3143_v24 = vld [vmem:[#allocation5 + $0x390] sm:$0xff] }
  0x53   :  { %1832 = vmatpush.bf16.msra.mxu3 %v3123_v30  ;;  %v3125_v30 = vld [vmem:[#allocation5 + $0x300] sm:$0xff] }
  0x54   :  { %1794 = vmatpush.bf16.msra.mxu0 %v3098_v33  ;;  %v3149_v33 = vld [vmem:[#allocation5 + $0x3c0] sm:$0xff] }
  0x55   :  { %1807 = vmatpush.bf16.msra.mxu1 %v3106_v34  ;;  %v3164_v34 = vld [vmem:[#allocation5 + $0x438] sm:$0xff] }
  0x56   :  { %1820 = vmatpush.bf16.msra.mxu2 %v3114_v35  ;;  %v3172_v35 = vld [vmem:[#allocation5 + $0x478] sm:$0xff] }
  0x57   :  { %1833 = vmatpush.bf16.msra.mxu3 %v3122_v36  ;;  %v3180_v36 = vld [vmem:[#allocation5 + $0x4b8] sm:$0xff] }
  0x58   :  { %1795 = vmatpush.bf16.msra.mxu0 %v3097_v37  ;;  %v3188_v37 = vld [vmem:[#allocation5 + $0x4f8] sm:$0xff] }
  0x59   :  { %1808 = vmatpush.bf16.msra.mxu1 %v3105_v38  ;;  %v136_v38 = vpack.c.bf16 %v3410_v4, %v3410_v4  ;;  %v3173_v4 = vld [vmem:[#allocation5 + $0x480] sm:$0xff] }
  0x5a   :  { %1821 = vmatpush.bf16.msra.mxu2 %v3113_v39  ;;  %v138_v39 = vpack.c.bf16 %v3412_v5, %v3412_v5  ;;  %v3181_v5 = vld [vmem:[#allocation5 + $0x4c0] sm:$0xff] }
  0x5b   :  { %1834 = vmatpush.bf16.msra.mxu3 %v3121_v40  ;;  %v137_v40 = vpack.c.bf16 %v3414_v6, %v3414_v6  ;;  %v3196_v6 = vld [vmem:[#allocation5 + $0x538] sm:$0xff] }
  0x5c   :  { %1796 = vmatpush.bf16.msra.mxu0 %v3096_v41  ;;  %v139_v41 = vpack.c.bf16 %v3416_v9, %v3416_v9  ;;  %v94_v9 = vld.sshfl [vmem:[#allocation1 + $0x10] sm:$0xff pattern:$0x73625140] }
  0x5d   :  { %1809 = vmatpush.bf16.msra.mxu1 %v3104_v42  ;;  %v3163_v42 = vld [vmem:[#allocation5 + $0x430] sm:$0xff] }
  0x5e   :  { %1822 = vmatpush.bf16.msra.mxu2 %v3112_v43  ;;  %v3171_v43 = vld [vmem:[#allocation5 + $0x470] sm:$0xff] }
  0x5f   :  { %1835 = vmatpush.bf16.msra.mxu3 %v3120_v44  ;;  %v3179_v44 = vld [vmem:[#allocation5 + $0x4b0] sm:$0xff] }
  0x60   :  { %1797 = vmatpush.bf16.msra.mxu0 %v3095_v45  ;;  %v3187_v45 = vld [vmem:[#allocation5 + $0x4f0] sm:$0xff] }
  0x61   :  { %1810 = vmatpush.bf16.msra.mxu1 %v3103_v46  ;;  %v3162_v46 = vld [vmem:[#allocation5 + $0x428] sm:$0xff] }
  0x62   :  { %1823 = vmatpush.bf16.msra.mxu2 %v3111_v47  ;;  %v3170_v47 = vld [vmem:[#allocation5 + $0x468] sm:$0xff] }
  0x63   :  { %1836 = vmatpush.bf16.msra.mxu3 %v3119_v48  ;;  %v3178_v48 = vld [vmem:[#allocation5 + $0x4a8] sm:$0xff] }
  0x64   :  { %1798 = vmatpush.bf16.msra.mxu0 %v3094_v49  ;;  %v3186_v49 = vld [vmem:[#allocation5 + $0x4e8] sm:$0xff] }
  0x65   :  { %1811 = vmatpush.bf16.msra.mxu1 %v3102_v50  ;;  %v3161_v50 = vld [vmem:[#allocation5 + $0x420] sm:$0xff] }
  0x66   :  { %1824 = vmatpush.bf16.msra.mxu2 %v3110_v51  ;;  %v3169_v51 = vld [vmem:[#allocation5 + $0x460] sm:$0xff] }
  0x67   :  { %1837 = vmatpush.bf16.msra.mxu3 %v3118_v52  ;;  %v3177_v52 = vld [vmem:[#allocation5 + $0x4a0] sm:$0xff] }
  0x68   :  { %1799 = vmatpush.bf16.msra.mxu0 %v3093_v53  ;;  %v3185_v53 = vld [vmem:[#allocation5 + $0x4e0] sm:$0xff] }
  0x69   :  { %1812 = vmatpush.bf16.msra.mxu1 %v3101_v54  ;;  %v3160_v54 = vld [vmem:[#allocation5 + $0x418] sm:$0xff] }
  0x6a   :  { %1825 = vmatpush.bf16.msra.mxu2 %v3109_v55  ;;  %v3168_v55 = vld [vmem:[#allocation5 + $0x458] sm:$0xff] }
  0x6b   :  { %1838 = vmatpush.bf16.msra.mxu3 %v3117_v56  ;;  %1800 = vmatmul.bf16.vlgmr.msra.gmra.mxu0 %v132_v61  ;;  %v3176_v56 = vld [vmem:[#allocation5 + $0x498] sm:$0xff]  ;;  %v3183_v61 = vld [vmem:[#allocation5 + $0x4d0] sm:$0xff] }
  0x6c   :  { %1844 = vmatpush.bf16.msrb.mxu0 %v3132_v57  ;;  %1813 = vmatmul.bf16.vlgmr.msra.gmra.mxu1 %v133_v0  ;;  %v3184_v57 = vld [vmem:[#allocation5 + $0x4d8] sm:$0xff]  ;;  %v3174_v0 = vld [vmem:[#allocation5 + $0x488] sm:$0xff] }
  0x6d   :  { %1857 = vmatpush.bf16.msrb.mxu1 %v3140_v58  ;;  %1826 = vmatmul.bf16.vlgmr.msra.gmra.mxu2 %v134_v62  ;;  %v3159_v58 = vld [vmem:[#allocation5 + $0x410] sm:$0xff]  ;;  %v3158_v62 = vld [vmem:[#allocation5 + $0x408] sm:$0xff] }
  0x6e   :  { %1870 = vmatpush.bf16.msrb.mxu2 %v3148_v59  ;;  %1839 = vmatmul.bf16.vlgmr.msra.gmra.mxu3 %v135_v1  ;;  %v3167_v59 = vld [vmem:[#allocation5 + $0x450] sm:$0xff]  ;;  %v3182_v1 = vld [vmem:[#allocation5 + $0x4c8] sm:$0xff] }
  0x6f   :  { %1883 = vmatpush.bf16.msrb.mxu3 %v3156_v60  ;;  %v3175_v60 = vld [vmem:[#allocation5 + $0x490] sm:$0xff] }
  0x70   :  { %1845 = vmatpush.bf16.msrb.mxu0 %v3131_v63  ;;  %v3166_v63 = vld [vmem:[#allocation5 + $0x448] sm:$0xff] }
  0x71   :  { %1858 = vmatpush.bf16.msrb.mxu1 %v3139_v2  ;;  %v3157_v2 = vld [vmem:[#allocation5 + $0x400] sm:$0xff] }
  0x72   :  { %1871 = vmatpush.bf16.msrb.mxu2 %v3147_v3  ;;  %v3165_v3 = vld [vmem:[#allocation5 + $0x440] sm:$0xff] }
  0x73   :  { %1884 = vmatpush.bf16.msrb.mxu3 %v3155_v7  ;;  %v3204_v7 = vld [vmem:[#allocation5 + $0x578] sm:$0xff] }
  0x74   :  { %1846 = vmatpush.bf16.msrb.mxu0 %v3130_v10  ;;  %v93_v10 = vld.sshfl [vmem:[#allocation1 + $0x8] sm:$0xff pattern:$0x73625140] }
  0x75   :  { %1859 = vmatpush.bf16.msrb.mxu1 %v3138_v11  ;;  %v95_v11 = vld.sshfl [vmem:[#allocation1 + $0x18] sm:$0xff pattern:$0x73625140] }
  0x76   :  { %1872 = vmatpush.bf16.msrb.mxu2 %v3146_v12  ;;  %v3212_v12 = vld [vmem:[#allocation5 + $0x5b8] sm:$0xff] }
  0x77   :  { %1885 = vmatpush.bf16.msrb.mxu3 %v3154_v13  ;;  %v3220_v13 = vld [vmem:[#allocation5 + $0x5f8] sm:$0xff] }
  0x78   :  { %1847 = vmatpush.bf16.msrb.mxu0 %v3129_v14  ;;  %v140_v14 = vpack.c.bf16 %v92_v8, %v92_v8 }
  0x79   :  { %1860 = vmatpush.bf16.msrb.mxu1 %v3137_v15  ;;  %v142_v15 = vpack.c.bf16 %v94_v9, %v94_v9 }
  0x7a   :  { %1873 = vmatpush.bf16.msrb.mxu2 %v3145_v16  ;;  %v141_v16 = vpack.c.bf16 %v93_v10, %v93_v10 }
  0x7b   :  { %1886 = vmatpush.bf16.msrb.mxu3 %v3153_v17  ;;  %v143_v17 = vpack.c.bf16 %v95_v11, %v95_v11 }
  0x7c   :  { %1848 = vmatpush.bf16.msrb.mxu0 %v3128_v18  ;;  %v3195_v18 = vld [vmem:[#allocation5 + $0x530] sm:$0xff] }
  0x7d   :  { %1861 = vmatpush.bf16.msrb.mxu1 %v3136_v19  ;;  %v3203_v19 = vld [vmem:[#allocation5 + $0x570] sm:$0xff] }
  0x7e   :  { %1874 = vmatpush.bf16.msrb.mxu2 %v3144_v20  ;;  %v3211_v20 = vld [vmem:[#allocation5 + $0x5b0] sm:$0xff] }
  0x7f   :  { %1887 = vmatpush.bf16.msrb.mxu3 %v3152_v21  ;;  %v3219_v21 = vld [vmem:[#allocation5 + $0x5f0] sm:$0xff] }
  0x80   :  { %1849 = vmatpush.bf16.msrb.mxu0 %v3127_v22  ;;  %v3194_v22 = vld [vmem:[#allocation5 + $0x528] sm:$0xff] }
  0x81   :  { %1862 = vmatpush.bf16.msrb.mxu1 %v3135_v23  ;;  %v3202_v23 = vld [vmem:[#allocation5 + $0x568] sm:$0xff] }
  0x82   :  { %1875 = vmatpush.bf16.msrb.mxu2 %v3143_v24  ;;  %v3242_v24 = vld [vmem:[%s3491_s2] ss:$0 sm:$0xff] }
  0x83   :  { %1888 = vmatpush.bf16.msrb.mxu3 %v3151_v25  ;;  %v3210_v25 = vld [vmem:[#allocation5 + $0x5a8] sm:$0xff] }
  0x84   :  { %1850 = vmatpush.bf16.msrb.mxu0 %v3126_v26  ;;  %v3218_v26 = vld [vmem:[#allocation5 + $0x5e8] sm:$0xff] }
  0x85   :  { %1863 = vmatpush.bf16.msrb.mxu1 %v3134_v27 }
  0x86   :  { %1876 = vmatpush.bf16.msrb.mxu2 %v3142_v28  ;;  %v3193_v28 = vld [vmem:[#allocation5 + $0x520] sm:$0xff] }
  0x87   :  { %1889 = vmatpush.bf16.msrb.mxu3 %v3150_v29  ;;  %v3201_v29 = vld [vmem:[#allocation5 + $0x560] sm:$0xff] }
  0x88   :  { %1851 = vmatpush.bf16.msrb.mxu0 %v3125_v30 }
  0x89   :  { %1864 = vmatpush.bf16.msrb.mxu1 %v3133_v31 }
  0x8a   :  { %1877 = vmatpush.bf16.msrb.mxu2 %v3141_v32  ;;  %v3209_v32 = vld [vmem:[#allocation5 + $0x5a0] sm:$0xff] }
  0x8b   :  { %1890 = vmatpush.bf16.msrb.mxu3 %v3149_v33  ;;  %1852 = vmatmul.bf16.vlgmr.msrb.gmra.mxu0 %v136_v38  ;;  %v3217_v33 = vld [vmem:[#allocation5 + $0x5e0] sm:$0xff]  ;;  %v3216_v38 = vld [vmem:[#allocation5 + $0x5d8] sm:$0xff] }
  0x8c   :  { %1896 = vmatpush.bf16.msra.mxu0 %v3164_v34  ;;  %1865 = vmatmul.bf16.vlgmr.msrb.gmra.mxu1 %v137_v40 }
  0x8d   :  { %1909 = vmatpush.bf16.msra.mxu1 %v3172_v35  ;;  %1878 = vmatmul.bf16.vlgmr.msrb.gmra.mxu2 %v138_v39  ;;  %v3192_v35 = vld [vmem:[#allocation5 + $0x518] sm:$0xff] }
  0x8e   :  { %1922 = vmatpush.bf16.msra.mxu2 %v3180_v36  ;;  %1891 = vmatmul.bf16.vlgmr.msrb.gmra.mxu3 %v139_v41  ;;  %v3200_v36 = vld [vmem:[#allocation5 + $0x558] sm:$0xff] }
  0x8f   :  { %1935 = vmatpush.bf16.msra.mxu3 %v3188_v37  ;;  %v3208_v37 = vld [vmem:[#allocation5 + $0x598] sm:$0xff] }
  0x90   :  { %1897 = vmatpush.bf16.msra.mxu0 %v3163_v42 }
  0x91   :  { %1910 = vmatpush.bf16.msra.mxu1 %v3171_v43  ;;  %v3191_v43 = vld [vmem:[#allocation5 + $0x510] sm:$0xff] }
  0x92   :  { %1923 = vmatpush.bf16.msra.mxu2 %v3179_v44  ;;  %v3199_v44 = vld [vmem:[#allocation5 + $0x550] sm:$0xff] }
  0x93   :  { %1936 = vmatpush.bf16.msra.mxu3 %v3187_v45 }
  0x94   :  { %1898 = vmatpush.bf16.msra.mxu0 %v3162_v46 }
  0x95   :  { %1911 = vmatpush.bf16.msra.mxu1 %v3170_v47  ;;  %v3207_v47 = vld [vmem:[#allocation5 + $0x590] sm:$0xff] }
  0x96   :  { %1924 = vmatpush.bf16.msra.mxu2 %v3178_v48  ;;  %v3215_v48 = vld [vmem:[#allocation5 + $0x5d0] sm:$0xff] }
  0x97   :  { %1937 = vmatpush.bf16.msra.mxu3 %v3186_v49  ;;  %v3190_v49 = vld [vmem:[#allocation5 + $0x508] sm:$0xff] }
  0x98   :  { %1899 = vmatpush.bf16.msra.mxu0 %v3161_v50  ;;  %v3198_v50 = vld [vmem:[#allocation5 + $0x548] sm:$0xff] }
  0x99   :  { %1912 = vmatpush.bf16.msra.mxu1 %v3169_v51  ;;  %v3206_v51 = vld [vmem:[#allocation5 + $0x588] sm:$0xff] }
  0x9a   :  { %1925 = vmatpush.bf16.msra.mxu2 %v3177_v52  ;;  %v3214_v52 = vld [vmem:[#allocation5 + $0x5c8] sm:$0xff] }
  0x9b   :  { %1938 = vmatpush.bf16.msra.mxu3 %v3185_v53 }
  0x9c   :  { %1900 = vmatpush.bf16.msra.mxu0 %v3160_v54  ;;  %v3189_v54 = vld [vmem:[#allocation5 + $0x500] sm:$0xff] }
  0x9d   :  { %1913 = vmatpush.bf16.msra.mxu1 %v3168_v55 }
  0x9e   :  { %1926 = vmatpush.bf16.msra.mxu2 %v3176_v56  ;;  %v3197_v56 = vld [vmem:[#allocation5 + $0x540] sm:$0xff] }
  0x9f   :  { %1939 = vmatpush.bf16.msra.mxu3 %v3184_v57  ;;  %v3205_v57 = vld [vmem:[#allocation5 + $0x580] sm:$0xff] }
  0xa0   :  { %1901 = vmatpush.bf16.msra.mxu0 %v3159_v58  ;;  %v3213_v58 = vld [vmem:[#allocation5 + $0x5c0] sm:$0xff] }
  0xa1   :  { %1914 = vmatpush.bf16.msra.mxu1 %v3167_v59  ;;  %v96_v59 = vld.sshfl [vmem:[#allocation1 + $0x20] sm:$0xff pattern:$0x73625140] }
  0xa2   :  { %1927 = vmatpush.bf16.msra.mxu2 %v3175_v60  ;;  %v97_v60 = vld.sshfl [vmem:[#allocation1 + $0x28] sm:$0xff pattern:$0x73625140] }
  0xa3   :  { %1940 = vmatpush.bf16.msra.mxu3 %v3183_v61  ;;  %v98_v61 = vld.sshfl [vmem:[#allocation1 + $0x30] sm:$0xff pattern:$0x73625140] }
  0xa4   :  { %1902 = vmatpush.bf16.msra.mxu0 %v3158_v62  ;;  %v99_v62 = vld.sshfl [vmem:[#allocation1 + $0x38] sm:$0xff pattern:$0x73625140] }
  0xa5   :  { %1915 = vmatpush.bf16.msra.mxu1 %v3166_v63  ;;  %v144_v63 = vpack.c.bf16 %v96_v59, %v96_v59 }
  0xa6   :  { %1928 = vmatpush.bf16.msra.mxu2 %v3174_v0  ;;  %v145_v0 = vpack.c.bf16 %v97_v60, %v97_v60  ;;  %v3233_v60 = vld [vmem:[%s3494_s5 + $0x20] sm:$0xff] }
  0xa7   :  { %1941 = vmatpush.bf16.msra.mxu3 %v3182_v1  ;;  %v146_v1 = vpack.c.bf16 %v98_v61, %v98_v61 }
  0xa8   :  { %1903 = vmatpush.bf16.msra.mxu0 %v3157_v2  ;;  %v1697_v27 = vpop.f32.mrf.mxu0  ;;  %v147_v2 = vpack.c.bf16 %v99_v62, %v99_v62  ;;  %v3232_v62 = vld [vmem:[%s3494_s5 + $0x18] sm:$0xff] }
  0xa9   :  { %1916 = vmatpush.bf16.msra.mxu1 %v3165_v3  ;;  %v1698_v30 = vadd.f32 %v3242_v24, %v1697_v27  ;;  %v1710_v31 = vpop.f32.mrf.mxu1 }
  0xaa   :  { %1929 = vmatpush.bf16.msra.mxu2 %v3173_v4 }
  0xab   :  { %1942 = vmatpush.bf16.msra.mxu3 %v3181_v5  ;;  %1904 = vmatmul.bf16.vlgmr.msra.gmra.mxu0 %v140_v14  ;;  %v1711_v34 = vadd.f32 %v1710_v31, %v1698_v30  ;;  %v3228_v31 = vld [vmem:[%s3492_s3 + $0x38] sm:$0xff] }
  0xac   :  { %1948 = vmatpush.bf16.msrb.mxu0 %v3196_v6  ;;  %1917 = vmatmul.bf16.vlgmr.msra.gmra.mxu1 %v141_v16 }
  0xad   :  { %1961 = vmatpush.bf16.msrb.mxu1 %v3204_v7  ;;  %1930 = vmatmul.bf16.vlgmr.msra.gmra.mxu2 %v142_v15 }
  0xae   :  { %1974 = vmatpush.bf16.msrb.mxu2 %v3212_v12  ;;  %1943 = vmatmul.bf16.vlgmr.msra.gmra.mxu3 %v143_v17 }
  0xaf   :  { %1987 = vmatpush.bf16.msrb.mxu3 %v3220_v13 }
  0xb0   :  { %1949 = vmatpush.bf16.msrb.mxu0 %v3195_v18  ;;  %v1723_v39 = vpop.f32.mrf.mxu2  ;;  %v1699_v42 = vpop.f32.mrf.mxu0 }
  0xb1   :  { %1962 = vmatpush.bf16.msrb.mxu1 %v3203_v19  ;;  %v1724_v40 = vadd.f32 %v1723_v39, %v1711_v34  ;;  %v1736_v41 = vpop.f32.mrf.mxu3  ;;  %v1712_v46 = vpop.f32.mrf.mxu1  ;;  %v3227_v34 = vld [vmem:[%s3492_s3 + $0x30] sm:$0xff]  ;;  %v3224_v39 = vld [vmem:[%s3492_s3 + $0x18] sm:$0xff] }
  0xb2   :  { %1975 = vmatpush.bf16.msrb.mxu2 %v3211_v20 }
  0xb3   :  { %1988 = vmatpush.bf16.msrb.mxu3 %v3219_v21  ;;  %v1737_v45 = vadd.f32 %v1736_v41, %v1724_v40  ;;  %v3223_v41 = vld [vmem:[%s3492_s3 + $0x10] sm:$0xff] }
  0xb4   :  { %1950 = vmatpush.bf16.msrb.mxu0 %v3194_v22 }
  0xb5   :  { %1963 = vmatpush.bf16.msrb.mxu1 %v3202_v23 }
  0xb6   :  { %1976 = vmatpush.bf16.msrb.mxu2 %v3210_v25 }
  0xb7   :  { %1989 = vmatpush.bf16.msrb.mxu3 %v3218_v26 }
  0xb8   :  { %1951 = vmatpush.bf16.msrb.mxu0 %v3193_v28  ;;  %v1725_v53 = vpop.f32.mrf.mxu2 }
  0xb9   :  { %1964 = vmatpush.bf16.msrb.mxu1 %v3201_v29  ;;  %v1738_v55 = vpop.f32.mrf.mxu3 }
  0xba   :  { %1977 = vmatpush.bf16.msrb.mxu2 %v3209_v32  ;;  %v3235_v55 = vld [vmem:[%s3494_s5 + $0x30] sm:$0xff] }
  0xbb   :  { %1990 = vmatpush.bf16.msrb.mxu3 %v3217_v33 }
  0xbc   :  { %1952 = vmatpush.bf16.msrb.mxu0 %v3192_v35  ;;  %v3226_v35 = vld [vmem:[%s3492_s3 + $0x28] sm:$0xff] }
  0xbd   :  { %1965 = vmatpush.bf16.msrb.mxu1 %v3200_v36 }
  0xbe   :  { %1978 = vmatpush.bf16.msrb.mxu2 %v3208_v37 }
  0xbf   :  { %1991 = vmatpush.bf16.msrb.mxu3 %v3216_v38  ;;  %v3225_v38 = vld [vmem:[%s3492_s3 + $0x20] sm:$0xff] }
  0xc0   :  { %1953 = vmatpush.bf16.msrb.mxu0 %v3191_v43  ;;  %v3222_v43 = vld [vmem:[%s3492_s3 + $0x8] sm:$0xff] }
  0xc1   :  { %1966 = vmatpush.bf16.msrb.mxu1 %v3199_v44 }
  0xc2   :  { %1979 = vmatpush.bf16.msrb.mxu2 %v3207_v47 }
  0xc3   :  { %1992 = vmatpush.bf16.msrb.mxu3 %v3215_v48  ;;  %v3221_v48 = vld [vmem:[%s3492_s3] sm:$0xff] }
  0xc4   :  { %1954 = vmatpush.bf16.msrb.mxu0 %v3190_v49 }
  0xc5   :  { %1967 = vmatpush.bf16.msrb.mxu1 %v3198_v50 }
  0xc6   :  { %1980 = vmatpush.bf16.msrb.mxu2 %v3206_v51 }
  0xc7   :  { %1993 = vmatpush.bf16.msrb.mxu3 %v3214_v52  ;;  %v3236_v52 = vld [vmem:[%s3494_s5 + $0x38] sm:$0xff] }
  0xc8   :  { %1955 = vmatpush.bf16.msrb.mxu0 %v3189_v54  ;;  %v1749_v3 = vpop.f32.mrf.mxu0 }
  0xc9   :  { %1968 = vmatpush.bf16.msrb.mxu1 %v3197_v56  ;;  %v1750_v4 = vadd.f32 %v1749_v3, %v1737_v45  ;;  %v1762_v5 = vpop.f32.mrf.mxu1  ;;  %v3231_v3 = vld [vmem:[%s3494_s5 + $0x10] sm:$0xff] }
  0xca   :  { %1981 = vmatpush.bf16.msrb.mxu2 %v3205_v57 }
  0xcb   :  { %1994 = vmatpush.bf16.msrb.mxu3 %v3213_v58  ;;  %1956 = vmatmul.bf16.vlgmr.msrb.gmra.mxu0 %v144_v63  ;;  %v1763_v6 = vadd.f32 %v1762_v5, %v1750_v4  ;;  %v3234_v58 = vld [vmem:[%s3494_s5 + $0x28] sm:$0xff] }
  0xcc   :  { %1969 = vmatmul.bf16.vlgmr.msrb.gmra.mxu1 %v145_v0  ;;  %2070 = vmatpush.bf16.msra.mxu0 %v3228_v31 }
  0xcd   :  { %1982 = vmatmul.bf16.vlgmr.msrb.gmra.mxu2 %v146_v1  ;;  %2153 = vmatpush.bf16.msra.mxu1 %v3236_v52 }
  0xce   :  { %1995 = vmatmul.bf16.vlgmr.msrb.gmra.mxu3 %v147_v2 }
  0xd0   :  { %v1775_v7 = vpop.f32.mrf.mxu2  ;;  %v1751_v10 = vpop.f32.mrf.mxu0  ;;  %2071 = vmatpush.bf16.msra.mxu0 %v3227_v34 }
  0xd1   :  { %v1776_v8 = vadd.f32 %v1775_v7, %v1763_v6  ;;  %v1788_v9 = vpop.f32.mrf.mxu3  ;;  %v1764_v12 = vpop.f32.mrf.mxu1  ;;  %2154 = vmatpush.bf16.msra.mxu1 %v3235_v55 }
  0xd3   :  { %v1789_v11 = vadd.f32 %v1788_v9, %v1776_v8 }
  0xd4   :  { %2072 = vmatpush.bf16.msra.mxu0 %v3226_v35 }
  0xd5   :  { %2155 = vmatpush.bf16.msra.mxu1 %v3234_v58 }
  0xd8   :  { %v1777_v13 = vpop.f32.mrf.mxu2  ;;  %2073 = vmatpush.bf16.msra.mxu0 %v3225_v38 }
  0xd9   :  { %v1790_v14 = vpop.f32.mrf.mxu3  ;;  %2156 = vmatpush.bf16.msra.mxu1 %v3233_v60 }
  0xdc   :  { %2074 = vmatpush.bf16.msra.mxu0 %v3224_v39 }
  0xdd   :  { %2157 = vmatpush.bf16.msra.mxu1 %v3232_v62 }
  0xe0   :  { %2075 = vmatpush.bf16.msra.mxu0 %v3223_v41 }
  0xe1   :  { %2158 = vmatpush.bf16.msra.mxu1 %v3231_v3 }
  0xe4   :  { %2076 = vmatpush.bf16.msra.mxu0 %v3222_v43 }
  0xe8   :  { %v1801_v15 = vpop.f32.mrf.mxu0  ;;  %2077 = vmatpush.bf16.msra.mxu0 %v3221_v48 }
  0xe9   :  { %v1802_v16 = vadd.f32 %v1801_v15, %v1789_v11  ;;  %v1814_v17 = vpop.f32.mrf.mxu1  ;;  %v3230_v15 = vld [vmem:[%s3494_s5 + $0x8] sm:$0xff] }
  0xea   :  { %2159 = vmatpush.bf16.msra.mxu1 %v3230_v15 }
  0xeb   :  { %v1815_v18 = vadd.f32 %v1814_v17, %v1802_v16  ;;  %v3229_v16 = vld [vmem:[%s3494_s5] sm:$0xff] }
  0xec   :  { %v3243_v17 = vld [vmem:[%s3493_s4] ss:$0 sm:$0xff]  ;;  %s3331_s4 = smov [#allocation7]  }
  0xed   :  { %s2184_s5 = sshll.u32 %s3331_s4, 4  ;;  %s2185_s5 = int_to_ptr.vmem [resolvable:$true] %s2184_s5 }
  0xee   :  { %2160 = vmatpush.bf16.msra.mxu1 %v3229_v16 }
  0xf0   :  { %v1827_v19 = vpop.f32.mrf.mxu2  ;;  %v1803_v22 = vpop.f32.mrf.mxu0 }
  0xf1   :  { %v1828_v20 = vadd.f32 %v1827_v19, %v1815_v18  ;;  %v1840_v21 = vpop.f32.mrf.mxu3  ;;  %v1816_v24 = vpop.f32.mrf.mxu1 }
  0xf3   :  { %v1841_v23 = vadd.f32 %v1840_v21, %v1828_v20 }
  0xf8   :  { %v1829_v25 = vpop.f32.mrf.mxu2 }
  0xf9   :  { %v1842_v26 = vpop.f32.mrf.mxu3 }
 0x108   :  { %v1853_v27 = vpop.f32.mrf.mxu0 }
 0x109   :  { %v1866_v28 = vpop.f32.mrf.mxu1  ;;  %v1854_v45 = vadd.f32 %v1853_v27, %v1841_v23  ;;  %v3244_v23 = vld [vmem:[%s3495_s6] ss:$0 sm:$0xff] }
 0x10b   :  { %v1867_v50 = vadd.f32 %v1866_v28, %v1854_v45 }
 0x110   :  { %v1879_v29 = vpop.f32.mrf.mxu2  ;;  %v1855_v32 = vpop.f32.mrf.mxu0 }
 0x111   :  { %v1892_v30 = vpop.f32.mrf.mxu3  ;;  %v1868_v33 = vpop.f32.mrf.mxu1  ;;  %v1880_v51 = vadd.f32 %v1879_v29, %v1867_v50 }
 0x113   :  { %v1893_v56 = vadd.f32 %v1892_v30, %v1880_v51 }
 0x118   :  { %v1881_v36 = vpop.f32.mrf.mxu2 }
 0x119   :  { %v1894_v37 = vpop.f32.mrf.mxu3 }
 0x128   :  { %v1905_v40 = vpop.f32.mrf.mxu0 }
 0x129   :  { %v1918_v42 = vpop.f32.mrf.mxu1  ;;  %v1906_v57 = vadd.f32 %v1905_v40, %v1893_v56 }
 0x12b   :  { %v1919_v59 = vadd.f32 %v1918_v42, %v1906_v57 }
 0x130   :  { %v1931_v44 = vpop.f32.mrf.mxu2  ;;  %v1907_v47 = vpop.f32.mrf.mxu0 }
 0x131   :  { %v1944_v46 = vpop.f32.mrf.mxu3  ;;  %v1920_v49 = vpop.f32.mrf.mxu1  ;;  %v1932_v61 = vadd.f32 %v1931_v44, %v1919_v59 }
 0x133   :  { %v1945_v63 = vadd.f32 %v1944_v46, %v1932_v61 }
 0x138   :  { %v1933_v53 = vpop.f32.mrf.mxu2 }
 0x139   :  { %v1946_v54 = vpop.f32.mrf.mxu3 }
 0x148   :  { %v1957_v0 = vpop.f32.mrf.mxu0 }
 0x149   :  { %v1970_v1 = vpop.f32.mrf.mxu1  ;;  %v1958_v2 = vadd.f32 %v1957_v0, %v1945_v63 }
 0x14b   :  { %v1971_v4 = vadd.f32 %v1970_v1, %v1958_v2 }
 0x150   :  { %v1983_v5 = vpop.f32.mrf.mxu2  ;;  %v1959_v8 = vpop.f32.mrf.mxu0 }
 0x151   :  { %v1996_v6 = vpop.f32.mrf.mxu3  ;;  %v1984_v7 = vadd.f32 %v1983_v5, %v1971_v4  ;;  %v1972_v9 = vpop.f32.mrf.mxu1 }
 0x153   :  { %v1997_v10 = vadd.f32 %v1996_v6, %v1984_v7 }
 0x155   :  { %v2000_v11 = vmax.f32 %v1997_v10, 0.0 }
 0x157   :  { %v2001_v12 = vpack.c.bf16 %v2000_v11, %v2000_v11 }
 0x158   :  { %v1985_v13 = vpop.f32.mrf.mxu2 }
 0x159   :  { %v1998_v14 = vpop.f32.mrf.mxu3  ;;  %2078 = vmatmul.bf16.vlgmr.msra.gmra.mxu0 %v2001_v12 }
 0x1d6   :  { %v2079_v18 = vpop.f32.mrf.mxu0 }
 0x1d7   :  { %v2080_v19 = vadd.f32 %v3243_v17, %v2079_v18 }
 0x1d9   :  { %v2083_v20 = vmax.f32 %v2080_v19, 0.0 }
 0x1db   :  { %v2084_v21 = vpack.c.bf16 %v2083_v20, %v2083_v20 }
 0x1dd   :  { %2161 = vmatmul.bf16.vlgmr.msra.gmra.mxu1 %v2084_v21 }
 0x1de   :  { %v2081_v22 = vpop.f32.mrf.mxu0 }
 0x25a   :  { %v2162_v24 = vpop.f32.mrf.mxu1 }
 0x25b   :  { %v2163_v25 = vadd.f32 %v3244_v23, %v2162_v24 }
 0x25d   :  { %v2167_v26 = vsel %vm2166_vm0, %v2163_v25, -inf }
 0x25e   :  { %2168 = vmax.xlane.f32.xlu0 %v2167_v26 }
 0x262   :  { %v2164_v27 = vpop.f32.mrf.mxu1 }
 0x2d1   :  { %v2169_v28 = vpop.xlane.xlu0 %2168 }
 0x2d2   :  { %v2170_v29 = vsub.f32 %v2163_v25, %v2169_v28 }
 0x2d4   :  { %v2171_v30 = vmul.f32 1.442695, %v2170_v29 }
 0x2d6   :  { %3245 = vpow2.f32 %v2171_v30 }
 0x2dc   :  { %v3246_v31 = vpop.eup %3245 }
 0x2dd   :  { %v2173_v32 = vsel %vm2166_vm0, %v3246_v31, 0.0 }
 0x2de   :  { %2174 = vadd.xlane.f32.xlu0 %v2173_v32 }
 0x351   :  { %v2175_v33 = vpop.xlane.xlu0 %2174 }
 0x352   :  { %3247 = vrcp.f32 %v2175_v33 }
 0x358   :  { %v3248_v34 = vpop.eup %3247 }
 0x359   :  { %v2177_v35 = vmul.f32 %v3248_v34, %v3246_v31 }
 0x35b   :  { %2178 = vst.msk [vmem:[#allocation7] sm:$0x3] %vm2166_vm0, %v2177_v35 }
 0x35c   :  { %2189 = dma.vmem_to_hbm [thread:$0]  %s2185_s5, 32, %s2187_s22, [#allocation4]  }
 0x35d   :  { %3325 = dma.done.wait [#allocation4], 32  }
 0x35e   :  { %3326 = vsyncadd [#allocation4], 4294967264 }
 0x35f   :  { %2194 = vsyncpa [#allocation3], 1 }
 0x360   :  { %2195 = vsyncpa [#allocation6], 1 }
 0x361   :  { %2196 = vsyncpa [#allocation4], 1 }

// kernel: tpu_custom_call.1
= control target key start
LH: loop header
LB: loop body
LE: loop exit
PB: predicated region body
PF: predicated region fallthrough
CT: control target
= control target key end

     0   :  { %12 = vsyncpa [#allocation3], 0  ;;  %s3489_s0 = inlined_call_operand.hbm [shape: f32[2,3072], index: 0, kind: input, shape index: {}]   ;;  %s3490_s1 = inlined_call_operand.hbm [shape: bf16[3072,128], index: 1, kind: input, shape index: {}]   ;;  %s3491_s2 = inlined_call_operand.vmem [shape: f32[1,128], index: 2, kind: input, shape index: {}]   ;;  %s3492_s3 = inlined_call_operand.vmem [shape: bf16[128,128], index: 3, kind: input, shape index: {}]   ;;  %s3493_s4 = inlined_call_operand.vmem [shape: f32[1,128], index: 4, kind: input, shape index: {}]   ;;  %s3494_s5 = inlined_call_operand.vmem [shape: bf16[128,10], index: 5, kind: input, shape index: {}]   ;;  %s3495_s6 = inlined_call_operand.vmem [shape: f32[1,10], index: 6, kind: input, shape index: {}]   ;;  %s3496_s7 = inlined_call_operand.hbm [shape: f32[2,10], index: 7, kind: output, shape index: {}]  }
   0x1   :  { %13 = vsyncpa [#allocation6], 0 }
   0x2   :  { %14 = vsyncpa [#allocation4], 0  ;;  %s20_s26 = sshll.u32 %s3489_s0, 4  ;;  %s3327_s27 = smov [#allocation2]   ;;  %s21_s26 = int_to_ptr.hbm [resolvable:$true] %s20_s26 }
   0x3   :  { %s22_s28 = sshll.u32 %s3327_s27, 4  ;;  %s30_s8 = sshll.u32 %s3490_s1, 4  ;;  %s23_s28 = int_to_ptr.vmem [resolvable:$true] %s22_s28  ;;  %s31_s8 = int_to_ptr.hbm [resolvable:$true] %s30_s8 }
   0x4   :  { %25 = dma.hbm_to_vmem [thread:$0]  %s21_s26, 768, %s23_s28, [#allocation3]  }
   0x5   :  { %s3328_s9 = smov [#allocation5]   ;;  %s3329_s11 = smov 64  }
   0x6   :  { %s32_s10 = sshll.u32 %s3328_s9, 4  ;;  %s3330_s12 = smov 4   ;;  %s33_s10 = int_to_ptr.vmem [resolvable:$true] %s32_s10 }
   0x7   :  { %38 = dma.hbm_to_vmem [thread:$0]  %s31_s8, 24576, %s33_s10, [#allocation6], %s3329_s11, %s3329_s11, %s3330_s12  }
   0x8   :  { %3321 = dma.done.wait [#allocation3], 768  }
   0x9   :  { %3322 = vsyncadd [#allocation3], 4294966528 }
   0xa   :  { %3323 = dma.done.wait [#allocation6], 24576  }
   0xb   :  { %3324 = vsyncadd [#allocation6], 4294942720  ;;  %v3036_v0 = vld [vmem:[#allocation5 + $0x38] sm:$0xff]  ;;  %v3035_v4 = vld [vmem:[#allocation5 + $0x30] sm:$0xff]  ;;  %vm2166_vm0 = vcmask 74752   ;;  %s2186_s22 = sshll.u32 %s3496_s7, 4  ;;  %s2187_s22 = int_to_ptr.hbm [resolvable:$true] %s2186_s22 }
   0xc   :  { %v3044_v1 = vld [vmem:[#allocation5 + $0x78] sm:$0xff]  ;;  %1688 = vmatpush.bf16.msra.mxu0 %v3036_v0  ;;  %v3043_v5 = vld [vmem:[#allocation5 + $0x70] sm:$0xff]  ;;  %v3034_v8 = vld [vmem:[#allocation5 + $0x28] sm:$0xff] }
   0xd   :  { %v3052_v2 = vld [vmem:[#allocation5 + $0xb8] sm:$0xff]  ;;  %1701 = vmatpush.bf16.msra.mxu1 %v3044_v1  ;;  %v3051_v6 = vld [vmem:[#allocation5 + $0xb0] sm:$0xff]  ;;  %v3042_v9 = vld [vmem:[#allocation5 + $0x68] sm:$0xff] }
   0xe   :  { %v3060_v3 = vld [vmem:[#allocation5 + $0xf8] sm:$0xff]  ;;  %1714 = vmatpush.bf16.msra.mxu2 %v3052_v2  ;;  %v3059_v7 = vld [vmem:[#allocation5 + $0xf0] sm:$0xff]  ;;  %v3050_v10 = vld [vmem:[#allocation5 + $0xa8] sm:$0xff] }
   0xf   :  { %1727 = vmatpush.bf16.msra.mxu3 %v3060_v3  ;;  %v3058_v11 = vld [vmem:[#allocation5 + $0xe8] sm:$0xff]  ;;  %v3033_v12 = vld [vmem:[#allocation5 + $0x20] sm:$0xff]  ;;  %v3032_v16 = vld [vmem:[#allocation5 + $0x18] sm:$0xff] }
  0x10   :  { %1689 = vmatpush.bf16.msra.mxu0 %v3035_v4  ;;  %v3041_v13 = vld [vmem:[#allocation5 + $0x60] sm:$0xff]  ;;  %v3040_v17 = vld [vmem:[#allocation5 + $0x58] sm:$0xff]  ;;  %v3031_v20 = vld [vmem:[#allocation5 + $0x10] sm:$0xff] }
  0x11   :  { %1702 = vmatpush.bf16.msra.mxu1 %v3043_v5  ;;  %v3049_v14 = vld [vmem:[#allocation5 + $0xa0] sm:$0xff]  ;;  %v3048_v18 = vld [vmem:[#allocation5 + $0x98] sm:$0xff]  ;;  %v3039_v21 = vld [vmem:[#allocation5 + $0x50] sm:$0xff] }
  0x12   :  { %1715 = vmatpush.bf16.msra.mxu2 %v3051_v6  ;;  %v3057_v15 = vld [vmem:[#allocation5 + $0xe0] sm:$0xff]  ;;  %v3056_v19 = vld [vmem:[#allocation5 + $0xd8] sm:$0xff]  ;;  %v57_v22 = vld [vmem:[#allocation2] sm:$0xff] }
  0x13   :  { %1728 = vmatpush.bf16.msra.mxu3 %v3059_v7  ;;  %69 = vst [vmem:[#allocation1] ss:$4 sm:$0xff] %v57_v22  ;;  %v3047_v23 = vld [vmem:[#allocation5 + $0x90] sm:$0xff]  ;;  %v3030_v25 = vld [vmem:[#allocation5 + $0x8] sm:$0xff]  ;;  %v3029_v29 = vld [vmem:[#allocation5] sm:$0xff] }
  0x14   :  { %1690 = vmatpush.bf16.msra.mxu0 %v3034_v8  ;;  %v3055_v24 = vld [vmem:[#allocation5 + $0xd0] sm:$0xff]  ;;  %v3038_v26 = vld [vmem:[#allocation5 + $0x48] sm:$0xff]  ;;  %v3037_v30 = vld [vmem:[#allocation5 + $0x40] sm:$0xff] }
  0x15   :  { %1703 = vmatpush.bf16.msra.mxu1 %v3042_v9  ;;  %v3046_v27 = vld [vmem:[#allocation5 + $0x88] sm:$0xff]  ;;  %v3045_v31 = vld [vmem:[#allocation5 + $0x80] sm:$0xff]  ;;  %v3068_v38 = vld [vmem:[#allocation5 + $0x138] sm:$0xff] }
  0x16   :  { %1716 = vmatpush.bf16.msra.mxu2 %v3050_v10  ;;  %v3054_v28 = vld [vmem:[#allocation5 + $0xc8] sm:$0xff]  ;;  %v3053_v33 = vld [vmem:[#allocation5 + $0xc0] sm:$0xff]  ;;  %v3076_v39 = vld [vmem:[#allocation5 + $0x178] sm:$0xff] }
  0x17   :  { %1729 = vmatpush.bf16.msra.mxu3 %v3058_v11  ;;  %v59_v35 = vld [vmem:[#allocation2 + $0x10] sm:$0xff]  ;;  %v3084_v40 = vld [vmem:[#allocation5 + $0x1b8] sm:$0xff]  ;;  %v3067_v47 = vld [vmem:[#allocation5 + $0x130] sm:$0xff] }
  0x18   :  { %1691 = vmatpush.bf16.msra.mxu0 %v3033_v12  ;;  %v3092_v41 = vld [vmem:[#allocation5 + $0x1f8] sm:$0xff]  ;;  %v3075_v48 = vld [vmem:[#allocation5 + $0x170] sm:$0xff]  ;;  %v3066_v51 = vld [vmem:[#allocation5 + $0x128] sm:$0xff] }
  0x19   :  { %1704 = vmatpush.bf16.msra.mxu1 %v3041_v13  ;;  %v58_v42 = vld [vmem:[#allocation2 + $0x8] sm:$0xff]  ;;  %v3083_v49 = vld [vmem:[#allocation5 + $0x1b0] sm:$0xff]  ;;  %v3074_v52 = vld [vmem:[#allocation5 + $0x168] sm:$0xff] }
  0x1a   :  { %1717 = vmatpush.bf16.msra.mxu2 %v3049_v14  ;;  %v74_v32 = vld.sshfl [vmem:[#allocation1 + $0x10] sm:$0xff pattern:$0x73625140]  ;;  %v72_v34 = vld.sshfl [vmem:[#allocation1] sm:$0xff pattern:$0x73625140] }
  0x1b   :  { %1730 = vmatpush.bf16.msra.mxu3 %v3057_v15  ;;  %v75_v36 = vld.sshfl [vmem:[#allocation1 + $0x18] sm:$0xff pattern:$0x73625140]  ;;  %v73_v37 = vld.sshfl [vmem:[#allocation1 + $0x8] sm:$0xff pattern:$0x73625140]  ;;  %v126_v43 = vpack.c.bf16 %v74_v32, %v74_v32  ;;  %v124_v44 = vpack.c.bf16 %v72_v34, %v72_v34 }
  0x1c   :  { %1692 = vmatpush.bf16.msra.mxu0 %v3032_v16  ;;  %80 = vst [vmem:[#allocation1] ss:$4 sm:$0xff] %v59_v35  ;;  %v127_v45 = vpack.c.bf16 %v75_v36, %v75_v36  ;;  %v125_v46 = vpack.c.bf16 %v73_v37, %v73_v37  ;;  %v3091_v50 = vld [vmem:[#allocation5 + $0x1f0] sm:$0xff]  ;;  %v3082_v53 = vld [vmem:[#allocation5 + $0x1a8] sm:$0xff]  ;;  %v3065_v55 = vld [vmem:[#allocation5 + $0x120] sm:$0xff] }
  0x1d   :  { %1705 = vmatpush.bf16.msra.mxu1 %v3040_v17  ;;  %71 = vst [vmem:[#allocation1 + $0x20] ss:$4 sm:$0xff] %v58_v42  ;;  %v3090_v54 = vld [vmem:[#allocation5 + $0x1e8] sm:$0xff]  ;;  %v3073_v57 = vld [vmem:[#allocation5 + $0x160] sm:$0xff]  ;;  %v3064_v0 = vld [vmem:[#allocation5 + $0x118] sm:$0xff] }
  0x1e   :  { %1718 = vmatpush.bf16.msra.mxu2 %v3048_v18  ;;  %v60_v59 = vld [vmem:[#allocation2 + $0x18] sm:$0xff]  ;;  %v3081_v62 = vld [vmem:[#allocation5 + $0x1a0] sm:$0xff]  ;;  %v3072_v1 = vld [vmem:[#allocation5 + $0x158] sm:$0xff] }
  0x1f   :  { %1731 = vmatpush.bf16.msra.mxu3 %v3056_v19  ;;  %v3089_v63 = vld [vmem:[#allocation5 + $0x1e0] sm:$0xff]  ;;  %v3080_v2 = vld [vmem:[#allocation5 + $0x198] sm:$0xff]  ;;  %v3063_v4 = vld [vmem:[#allocation5 + $0x110] sm:$0xff] }
  0x20   :  { %1693 = vmatpush.bf16.msra.mxu0 %v3031_v20  ;;  %v3088_v3 = vld [vmem:[#allocation5 + $0x1d8] sm:$0xff]  ;;  %v3071_v5 = vld [vmem:[#allocation5 + $0x150] sm:$0xff]  ;;  %v3062_v8 = vld [vmem:[#allocation5 + $0x108] sm:$0xff] }
  0x21   :  { %1706 = vmatpush.bf16.msra.mxu1 %v3039_v21  ;;  %v3079_v6 = vld [vmem:[#allocation5 + $0x190] sm:$0xff]  ;;  %v3070_v9 = vld [vmem:[#allocation5 + $0x148] sm:$0xff]  ;;  %v3061_v12 = vld [vmem:[#allocation5 + $0x100] sm:$0xff] }
  0x22   :  { %1719 = vmatpush.bf16.msra.mxu2 %v3047_v23  ;;  %v3087_v7 = vld [vmem:[#allocation5 + $0x1d0] sm:$0xff]  ;;  %v3078_v10 = vld [vmem:[#allocation5 + $0x188] sm:$0xff]  ;;  %v3069_v13 = vld [vmem:[#allocation5 + $0x140] sm:$0xff] }
  0x23   :  { %1732 = vmatpush.bf16.msra.mxu3 %v3055_v24  ;;  %v3086_v11 = vld [vmem:[#allocation5 + $0x1c8] sm:$0xff]  ;;  %v3077_v14 = vld [vmem:[#allocation5 + $0x180] sm:$0xff]  ;;  %v3100_v16 = vld [vmem:[#allocation5 + $0x238] sm:$0xff] }
  0x24   :  { %1694 = vmatpush.bf16.msra.mxu0 %v3030_v25  ;;  %v3378_v56 = vld.sshfl [vmem:[#allocation1 + $0x30] sm:$0xff pattern:$0x73625140]  ;;  %v3380_v58 = vld.sshfl [vmem:[#allocation1 + $0x20] sm:$0xff pattern:$0x73625140] }
  0x25   :  { %1707 = vmatpush.bf16.msra.mxu1 %v3038_v26  ;;  %v3382_v60 = vld.sshfl [vmem:[#allocation1 + $0x38] sm:$0xff pattern:$0x73625140]  ;;  %v3384_v61 = vld.sshfl [vmem:[#allocation1 + $0x28] sm:$0xff pattern:$0x73625140]  ;;  %v130_v21 = vpack.c.bf16 %v3378_v56, %v3378_v56  ;;  %v128_v22 = vpack.c.bf16 %v3380_v58, %v3380_v58 }
  0x26   :  { %1720 = vmatpush.bf16.msra.mxu2 %v3046_v27  ;;  %81 = vst [vmem:[#allocation1 + $0x20] ss:$4 sm:$0xff] %v60_v59  ;;  %v3085_v15 = vld [vmem:[#allocation5 + $0x1c0] sm:$0xff]  ;;  %v3108_v17 = vld [vmem:[#allocation5 + $0x278] sm:$0xff]  ;;  %v3099_v20 = vld [vmem:[#allocation5 + $0x230] sm:$0xff]  ;;  %v131_v25 = vpack.c.bf16 %v3382_v60, %v3382_v60  ;;  %v129_v26 = vpack.c.bf16 %v3384_v61, %v3384_v61 }
  0x27   :  { %1733 = vmatpush.bf16.msra.mxu3 %v3054_v28  ;;  %v3116_v18 = vld [vmem:[#allocation5 + $0x2b8] sm:$0xff]  ;;  %v3107_v23 = vld [vmem:[#allocation5 + $0x270] sm:$0xff]  ;;  %v3394_v27 = vld.sshfl [vmem:[#allocation1] sm:$0xff pattern:$0x73625140] }
  0x28   :  { %1695 = vmatpush.bf16.msra.mxu0 %v3029_v29  ;;  %v3124_v19 = vld [vmem:[#allocation5 + $0x2f8] sm:$0xff]  ;;  %v3115_v24 = vld [vmem:[#allocation5 + $0x2b0] sm:$0xff]  ;;  %v3400_v32 = vld.sshfl [vmem:[#allocation1 + $0x18] sm:$0xff pattern:$0x73625140]  ;;  %v132_v61 = vpack.c.bf16 %v3394_v27, %v3394_v27 }
  0x29   :  { %1708 = vmatpush.bf16.msra.mxu1 %v3037_v30  ;;  %v3396_v28 = vld.sshfl [vmem:[#allocation1 + $0x10] sm:$0xff pattern:$0x73625140]  ;;  %v3398_v29 = vld.sshfl [vmem:[#allocation1 + $0x8] sm:$0xff pattern:$0x73625140] }
  0x2a   :  { %1721 = vmatpush.bf16.msra.mxu2 %v3045_v31  ;;  %v3123_v30 = vld [vmem:[#allocation5 + $0x2f0] sm:$0xff]  ;;  %v3106_v34 = vld [vmem:[#allocation5 + $0x268] sm:$0xff]  ;;  %v3097_v37 = vld [vmem:[#allocation5 + $0x220] sm:$0xff] }
  0x2b   :  { %1734 = vmatpush.bf16.msra.mxu3 %v3053_v33  ;;  %1696 = vmatmul.bf16.vlgmr.msra.gmra.mxu0 %v124_v44  ;;  %v61_v31 = vld [vmem:[#allocation2 + $0x20] sm:$0xff]  ;;  %v3098_v33 = vld [vmem:[#allocation5 + $0x228] sm:$0xff]  ;;  %v3104_v42 = vld [vmem:[#allocation5 + $0x258] sm:$0xff] }
  0x2c   :  { %1740 = vmatpush.bf16.msrb.mxu0 %v3068_v38  ;;  %1709 = vmatmul.bf16.vlgmr.msra.gmra.mxu1 %v125_v46  ;;  %90 = vst [vmem:[#allocation1] ss:$4 sm:$0xff] %v61_v31  ;;  %v3114_v35 = vld [vmem:[#allocation5 + $0x2a8] sm:$0xff]  ;;  %v3105_v38 = vld [vmem:[#allocation5 + $0x260] sm:$0xff]  ;;  %v3120_v44 = vld [vmem:[#allocation5 + $0x2d8] sm:$0xff] }
  0x2d   :  { %1753 = vmatpush.bf16.msrb.mxu1 %v3076_v39  ;;  %1722 = vmatmul.bf16.vlgmr.msra.gmra.mxu2 %v126_v43  ;;  %v3122_v36 = vld [vmem:[#allocation5 + $0x2e8] sm:$0xff]  ;;  %v3113_v39 = vld [vmem:[#allocation5 + $0x2a0] sm:$0xff]  ;;  %v3112_v43 = vld [vmem:[#allocation5 + $0x298] sm:$0xff] }
  0x2e   :  { %1766 = vmatpush.bf16.msrb.mxu2 %v3084_v40  ;;  %1735 = vmatmul.bf16.vlgmr.msra.gmra.mxu3 %v127_v45  ;;  %v3121_v40 = vld [vmem:[#allocation5 + $0x2e0] sm:$0xff]  ;;  %v3095_v45 = vld [vmem:[#allocation5 + $0x210] sm:$0xff]  ;;  %v3140_v58 = vld [vmem:[#allocation5 + $0x378] sm:$0xff] }
  0x2f   :  { %1779 = vmatpush.bf16.msrb.mxu3 %v3092_v41  ;;  %v3096_v41 = vld [vmem:[#allocation5 + $0x218] sm:$0xff]  ;;  %v3103_v46 = vld [vmem:[#allocation5 + $0x250] sm:$0xff]  ;;  %v3117_v56 = vld [vmem:[#allocation5 + $0x2c0] sm:$0xff] }
  0x30   :  { %1741 = vmatpush.bf16.msrb.mxu0 %v3067_v47  ;;  %v3111_v47 = vld [vmem:[#allocation5 + $0x290] sm:$0xff]  ;;  %v3148_v59 = vld [vmem:[#allocation5 + $0x3b8] sm:$0xff]  ;;  %v3134_v27 = vld [vmem:[#allocation5 + $0x348] sm:$0xff] }
  0x31   :  { %1754 = vmatpush.bf16.msrb.mxu1 %v3075_v48  ;;  %v3119_v48 = vld [vmem:[#allocation5 + $0x2d0] sm:$0xff]  ;;  %v3156_v60 = vld [vmem:[#allocation5 + $0x3f8] sm:$0xff]  ;;  %v3133_v31 = vld [vmem:[#allocation5 + $0x340] sm:$0xff] }
  0x32   :  { %1767 = vmatpush.bf16.msrb.mxu2 %v3083_v49  ;;  %v3094_v49 = vld [vmem:[#allocation5 + $0x208] sm:$0xff] }
  0x33   :  { %1780 = vmatpush.bf16.msrb.mxu3 %v3091_v50  ;;  %v3102_v50 = vld [vmem:[#allocation5 + $0x248] sm:$0xff] }
  0x34   :  { %1742 = vmatpush.bf16.msrb.mxu0 %v3066_v51  ;;  %v3110_v51 = vld [vmem:[#allocation5 + $0x288] sm:$0xff] }
  0x35   :  { %1755 = vmatpush.bf16.msrb.mxu1 %v3074_v52  ;;  %v3118_v52 = vld [vmem:[#allocation5 + $0x2c8] sm:$0xff] }
  0x36   :  { %1768 = vmatpush.bf16.msrb.mxu2 %v3082_v53  ;;  %v3093_v53 = vld [vmem:[#allocation5 + $0x200] sm:$0xff] }
  0x37   :  { %1781 = vmatpush.bf16.msrb.mxu3 %v3090_v54  ;;  %v3101_v54 = vld [vmem:[#allocation5 + $0x240] sm:$0xff] }
  0x38   :  { %1743 = vmatpush.bf16.msrb.mxu0 %v3065_v55  ;;  %v3109_v55 = vld [vmem:[#allocation5 + $0x280] sm:$0xff] }
  0x39   :  { %1756 = vmatpush.bf16.msrb.mxu1 %v3073_v57  ;;  %v3132_v57 = vld [vmem:[#allocation5 + $0x338] sm:$0xff] }
  0x3a   :  { %1769 = vmatpush.bf16.msrb.mxu2 %v3081_v62  ;;  %v134_v62 = vpack.c.bf16 %v3396_v28, %v3396_v28  ;;  %v3142_v28 = vld [vmem:[#allocation5 + $0x388] sm:$0xff] }
  0x3b   :  { %1782 = vmatpush.bf16.msrb.mxu3 %v3089_v63  ;;  %v3131_v63 = vld [vmem:[#allocation5 + $0x330] sm:$0xff] }
  0x3c   :  { %1744 = vmatpush.bf16.msrb.mxu0 %v3064_v0  ;;  %v133_v0 = vpack.c.bf16 %v3398_v29, %v3398_v29  ;;  %v3150_v29 = vld [vmem:[#allocation5 + $0x3c8] sm:$0xff] }
  0x3d   :  { %1757 = vmatpush.bf16.msrb.mxu1 %v3072_v1  ;;  %v135_v1 = vpack.c.bf16 %v3400_v32, %v3400_v32  ;;  %v3141_v32 = vld [vmem:[#allocation5 + $0x380] sm:$0xff] }
  0x3e   :  { %1770 = vmatpush.bf16.msrb.mxu2 %v3080_v2  ;;  %v3139_v2 = vld [vmem:[#allocation5 + $0x370] sm:$0xff] }
  0x3f   :  { %1783 = vmatpush.bf16.msrb.mxu3 %v3088_v3  ;;  %v3147_v3 = vld [vmem:[#allocation5 + $0x3b0] sm:$0xff] }
  0x40   :  { %1745 = vmatpush.bf16.msrb.mxu0 %v3063_v4  ;;  %v3410_v4 = vld.sshfl [vmem:[#allocation1 + $0x20] sm:$0xff pattern:$0x73625140] }
  0x41   :  { %1758 = vmatpush.bf16.msrb.mxu1 %v3071_v5  ;;  %v3412_v5 = vld.sshfl [vmem:[#allocation1 + $0x30] sm:$0xff pattern:$0x73625140] }
  0x42   :  { %1771 = vmatpush.bf16.msrb.mxu2 %v3079_v6  ;;  %v3414_v6 = vld.sshfl [vmem:[#allocation1 + $0x28] sm:$0xff pattern:$0x73625140] }
  0x43   :  { %1784 = vmatpush.bf16.msrb.mxu3 %v3087_v7  ;;  %v3155_v7 = vld [vmem:[#allocation5 + $0x3f0] sm:$0xff] }
  0x44   :  { %1746 = vmatpush.bf16.msrb.mxu0 %v3062_v8  ;;  %v62_v8 = vld [vmem:[#allocation2 + $0x28] sm:$0xff] }
  0x45   :  { %1759 = vmatpush.bf16.msrb.mxu1 %v3070_v9  ;;  %v3416_v9 = vld.sshfl [vmem:[#allocation1 + $0x38] sm:$0xff pattern:$0x73625140] }
  0x46   :  { %1772 = vmatpush.bf16.msrb.mxu2 %v3078_v10  ;;  %91 = vst [vmem:[#allocation1 + $0x20] ss:$4 sm:$0xff] %v62_v8  ;;  %v3130_v10 = vld [vmem:[#allocation5 + $0x328] sm:$0xff] }
  0x47   :  { %1785 = vmatpush.bf16.msrb.mxu3 %v3086_v11  ;;  %v3138_v11 = vld [vmem:[#allocation5 + $0x368] sm:$0xff] }
  0x48   :  { %1747 = vmatpush.bf16.msrb.mxu0 %v3061_v12  ;;  %v3146_v12 = vld [vmem:[#allocation5 + $0x3a8] sm:$0xff] }
  0x49   :  { %1760 = vmatpush.bf16.msrb.mxu1 %v3069_v13  ;;  %v3154_v13 = vld [vmem:[#allocation5 + $0x3e8] sm:$0xff] }
  0x4a   :  { %1773 = vmatpush.bf16.msrb.mxu2 %v3077_v14  ;;  %v3129_v14 = vld [vmem:[#allocation5 + $0x320] sm:$0xff]  ;;  %v92_v8 = vld.sshfl [vmem:[#allocation1] sm:$0xff pattern:$0x73625140] }
  0x4b   :  { %1786 = vmatpush.bf16.msrb.mxu3 %v3085_v15  ;;  %1748 = vmatmul.bf16.vlgmr.msrb.gmra.mxu0 %v128_v22  ;;  %v3137_v15 = vld [vmem:[#allocation5 + $0x360] sm:$0xff]  ;;  %v3127_v22 = vld [vmem:[#allocation5 + $0x310] sm:$0xff] }
  0x4c   :  { %1792 = vmatpush.bf16.msra.mxu0 %v3100_v16  ;;  %1761 = vmatmul.bf16.vlgmr.msrb.gmra.mxu1 %v129_v26  ;;  %v3145_v16 = vld [vmem:[#allocation5 + $0x3a0] sm:$0xff]  ;;  %v3126_v26 = vld [vmem:[#allocation5 + $0x308] sm:$0xff] }
  0x4d   :  { %1805 = vmatpush.bf16.msra.mxu1 %v3108_v17  ;;  %1774 = vmatmul.bf16.vlgmr.msrb.gmra.mxu2 %v130_v21  ;;  %v3153_v17 = vld [vmem:[#allocation5 + $0x3e0] sm:$0xff]  ;;  %v3152_v21 = vld [vmem:[#allocation5 + $0x3d8] sm:$0xff] }
  0x4e   :  { %1818 = vmatpush.bf16.msra.mxu2 %v3116_v18  ;;  %1787 = vmatmul.bf16.vlgmr.msrb.gmra.mxu3 %v131_v25  ;;  %v3128_v18 = vld [vmem:[#allocation5 + $0x318] sm:$0xff]  ;;  %v3151_v25 = vld [vmem:[#allocation5 + $0x3d0] sm:$0xff] }
  0x4f   :  { %1831 = vmatpush.bf16.msra.mxu3 %v3124_v19  ;;  %v3136_v19 = vld [vmem:[#allocation5 + $0x358] sm:$0xff] }
  0x50   :  { %1793 = vmatpush.bf16.msra.mxu0 %v3099_v20  ;;  %v3144_v20 = vld [vmem:[#allocation5 + $0x398] sm:$0xff] }
  0x51   :  { %1806 = vmatpush.bf16.msra.mxu1 %v3107_v23  ;;  %v3135_v23 = vld [vmem:[#allocation5 + $0x350] sm:$0xff] }
  0x52   :  { %1819 = vmatpush.bf16.msra.mxu2 %v3115_v24  ;;  %v3143_v24 = vld [vmem:[#allocation5 + $0x390] sm:$0xff] }
  0x53   :  { %1832 = vmatpush.bf16.msra.mxu3 %v3123_v30  ;;  %v3125_v30 = vld [vmem:[#allocation5 + $0x300] sm:$0xff] }
  0x54   :  { %1794 = vmatpush.bf16.msra.mxu0 %v3098_v33  ;;  %v3149_v33 = vld [vmem:[#allocation5 + $0x3c0] sm:$0xff] }
  0x55   :  { %1807 = vmatpush.bf16.msra.mxu1 %v3106_v34  ;;  %v3164_v34 = vld [vmem:[#allocation5 + $0x438] sm:$0xff] }
  0x56   :  { %1820 = vmatpush.bf16.msra.mxu2 %v3114_v35  ;;  %v3172_v35 = vld [vmem:[#allocation5 + $0x478] sm:$0xff] }
  0x57   :  { %1833 = vmatpush.bf16.msra.mxu3 %v3122_v36  ;;  %v3180_v36 = vld [vmem:[#allocation5 + $0x4b8] sm:$0xff] }
  0x58   :  { %1795 = vmatpush.bf16.msra.mxu0 %v3097_v37  ;;  %v3188_v37 = vld [vmem:[#allocation5 + $0x4f8] sm:$0xff] }
  0x59   :  { %1808 = vmatpush.bf16.msra.mxu1 %v3105_v38  ;;  %v136_v38 = vpack.c.bf16 %v3410_v4, %v3410_v4  ;;  %v3173_v4 = vld [vmem:[#allocation5 + $0x480] sm:$0xff] }
  0x5a   :  { %1821 = vmatpush.bf16.msra.mxu2 %v3113_v39  ;;  %v138_v39 = vpack.c.bf16 %v3412_v5, %v3412_v5  ;;  %v3181_v5 = vld [vmem:[#allocation5 + $0x4c0] sm:$0xff] }
  0x5b   :  { %1834 = vmatpush.bf16.msra.mxu3 %v3121_v40  ;;  %v137_v40 = vpack.c.bf16 %v3414_v6, %v3414_v6  ;;  %v3196_v6 = vld [vmem:[#allocation5 + $0x538] sm:$0xff] }
  0x5c   :  { %1796 = vmatpush.bf16.msra.mxu0 %v3096_v41  ;;  %v139_v41 = vpack.c.bf16 %v3416_v9, %v3416_v9  ;;  %v94_v9 = vld.sshfl [vmem:[#allocation1 + $0x10] sm:$0xff pattern:$0x73625140] }
  0x5d   :  { %1809 = vmatpush.bf16.msra.mxu1 %v3104_v42  ;;  %v3163_v42 = vld [vmem:[#allocation5 + $0x430] sm:$0xff] }
  0x5e   :  { %1822 = vmatpush.bf16.msra.mxu2 %v3112_v43  ;;  %v3171_v43 = vld [vmem:[#allocation5 + $0x470] sm:$0xff] }
  0x5f   :  { %1835 = vmatpush.bf16.msra.mxu3 %v3120_v44  ;;  %v3179_v44 = vld [vmem:[#allocation5 + $0x4b0] sm:$0xff] }
  0x60   :  { %1797 = vmatpush.bf16.msra.mxu0 %v3095_v45  ;;  %v3187_v45 = vld [vmem:[#allocation5 + $0x4f0] sm:$0xff] }
  0x61   :  { %1810 = vmatpush.bf16.msra.mxu1 %v3103_v46  ;;  %v3162_v46 = vld [vmem:[#allocation5 + $0x428] sm:$0xff] }
  0x62   :  { %1823 = vmatpush.bf16.msra.mxu2 %v3111_v47  ;;  %v3170_v47 = vld [vmem:[#allocation5 + $0x468] sm:$0xff] }
  0x63   :  { %1836 = vmatpush.bf16.msra.mxu3 %v3119_v48  ;;  %v3178_v48 = vld [vmem:[#allocation5 + $0x4a8] sm:$0xff] }
  0x64   :  { %1798 = vmatpush.bf16.msra.mxu0 %v3094_v49  ;;  %v3186_v49 = vld [vmem:[#allocation5 + $0x4e8] sm:$0xff] }
  0x65   :  { %1811 = vmatpush.bf16.msra.mxu1 %v3102_v50  ;;  %v3161_v50 = vld [vmem:[#allocation5 + $0x420] sm:$0xff] }
  0x66   :  { %1824 = vmatpush.bf16.msra.mxu2 %v3110_v51  ;;  %v3169_v51 = vld [vmem:[#allocation5 + $0x460] sm:$0xff] }
  0x67   :  { %1837 = vmatpush.bf16.msra.mxu3 %v3118_v52  ;;  %v3177_v52 = vld [vmem:[#allocation5 + $0x4a0] sm:$0xff] }
  0x68   :  { %1799 = vmatpush.bf16.msra.mxu0 %v3093_v53  ;;  %v3185_v53 = vld [vmem:[#allocation5 + $0x4e0] sm:$0xff] }
  0x69   :  { %1812 = vmatpush.bf16.msra.mxu1 %v3101_v54  ;;  %v3160_v54 = vld [vmem:[#allocation5 + $0x418] sm:$0xff] }
  0x6a   :  { %1825 = vmatpush.bf16.msra.mxu2 %v3109_v55  ;;  %v3168_v55 = vld [vmem:[#allocation5 + $0x458] sm:$0xff] }
  0x6b   :  { %1838 = vmatpush.bf16.msra.mxu3 %v3117_v56  ;;  %1800 = vmatmul.bf16.vlgmr.msra.gmra.mxu0 %v132_v61  ;;  %v3176_v56 = vld [vmem:[#allocation5 + $0x498] sm:$0xff]  ;;  %v3183_v61 = vld [vmem:[#allocation5 + $0x4d0] sm:$0xff] }
  0x6c   :  { %1844 = vmatpush.bf16.msrb.mxu0 %v3132_v57  ;;  %1813 = vmatmul.bf16.vlgmr.msra.gmra.mxu1 %v133_v0  ;;  %v3184_v57 = vld [vmem:[#allocation5 + $0x4d8] sm:$0xff]  ;;  %v3174_v0 = vld [vmem:[#allocation5 + $0x488] sm:$0xff] }
  0x6d   :  { %1857 = vmatpush.bf16.msrb.mxu1 %v3140_v58  ;;  %1826 = vmatmul.bf16.vlgmr.msra.gmra.mxu2 %v134_v62  ;;  %v3159_v58 = vld [vmem:[#allocation5 + $0x410] sm:$0xff]  ;;  %v3158_v62 = vld [vmem:[#allocation5 + $0x408] sm:$0xff] }
  0x6e   :  { %1870 = vmatpush.bf16.msrb.mxu2 %v3148_v59  ;;  %1839 = vmatmul.bf16.vlgmr.msra.gmra.mxu3 %v135_v1  ;;  %v3167_v59 = vld [vmem:[#allocation5 + $0x450] sm:$0xff]  ;;  %v3182_v1 = vld [vmem:[#allocation5 + $0x4c8] sm:$0xff] }
  0x6f   :  { %1883 = vmatpush.bf16.msrb.mxu3 %v3156_v60  ;;  %v3175_v60 = vld [vmem:[#allocation5 + $0x490] sm:$0xff] }
  0x70   :  { %1845 = vmatpush.bf16.msrb.mxu0 %v3131_v63  ;;  %v3166_v63 = vld [vmem:[#allocation5 + $0x448] sm:$0xff] }
  0x71   :  { %1858 = vmatpush.bf16.msrb.mxu1 %v3139_v2  ;;  %v3157_v2 = vld [vmem:[#allocation5 + $0x400] sm:$0xff] }
  0x72   :  { %1871 = vmatpush.bf16.msrb.mxu2 %v3147_v3  ;;  %v3165_v3 = vld [vmem:[#allocation5 + $0x440] sm:$0xff] }
  0x73   :  { %1884 = vmatpush.bf16.msrb.mxu3 %v3155_v7  ;;  %v3204_v7 = vld [vmem:[#allocation5 + $0x578] sm:$0xff] }
  0x74   :  { %1846 = vmatpush.bf16.msrb.mxu0 %v3130_v10  ;;  %v93_v10 = vld.sshfl [vmem:[#allocation1 + $0x8] sm:$0xff pattern:$0x73625140] }
  0x75   :  { %1859 = vmatpush.bf16.msrb.mxu1 %v3138_v11  ;;  %v95_v11 = vld.sshfl [vmem:[#allocation1 + $0x18] sm:$0xff pattern:$0x73625140] }
  0x76   :  { %1872 = vmatpush.bf16.msrb.mxu2 %v3146_v12  ;;  %v3212_v12 = vld [vmem:[#allocation5 + $0x5b8] sm:$0xff] }
  0x77   :  { %1885 = vmatpush.bf16.msrb.mxu3 %v3154_v13  ;;  %v3220_v13 = vld [vmem:[#allocation5 + $0x5f8] sm:$0xff] }
  0x78   :  { %1847 = vmatpush.bf16.msrb.mxu0 %v3129_v14  ;;  %v140_v14 = vpack.c.bf16 %v92_v8, %v92_v8 }
  0x79   :  { %1860 = vmatpush.bf16.msrb.mxu1 %v3137_v15  ;;  %v142_v15 = vpack.c.bf16 %v94_v9, %v94_v9 }
  0x7a   :  { %1873 = vmatpush.bf16.msrb.mxu2 %v3145_v16  ;;  %v141_v16 = vpack.c.bf16 %v93_v10, %v93_v10 }
  0x7b   :  { %1886 = vmatpush.bf16.msrb.mxu3 %v3153_v17  ;;  %v143_v17 = vpack.c.bf16 %v95_v11, %v95_v11 }
  0x7c   :  { %1848 = vmatpush.bf16.msrb.mxu0 %v3128_v18  ;;  %v3195_v18 = vld [vmem:[#allocation5 + $0x530] sm:$0xff] }
  0x7d   :  { %1861 = vmatpush.bf16.msrb.mxu1 %v3136_v19  ;;  %v3203_v19 = vld [vmem:[#allocation5 + $0x570] sm:$0xff] }
  0x7e   :  { %1874 = vmatpush.bf16.msrb.mxu2 %v3144_v20  ;;  %v3211_v20 = vld [vmem:[#allocation5 + $0x5b0] sm:$0xff] }
  0x7f   :  { %1887 = vmatpush.bf16.msrb.mxu3 %v3152_v21  ;;  %v3219_v21 = vld [vmem:[#allocation5 + $0x5f0] sm:$0xff] }
  0x80   :  { %1849 = vmatpush.bf16.msrb.mxu0 %v3127_v22  ;;  %v3194_v22 = vld [vmem:[#allocation5 + $0x528] sm:$0xff] }
  0x81   :  { %1862 = vmatpush.bf16.msrb.mxu1 %v3135_v23  ;;  %v3202_v23 = vld [vmem:[#allocation5 + $0x568] sm:$0xff] }
  0x82   :  { %1875 = vmatpush.bf16.msrb.mxu2 %v3143_v24  ;;  %v3242_v24 = vld [vmem:[%s3491_s2] ss:$0 sm:$0xff] }
  0x83   :  { %1888 = vmatpush.bf16.msrb.mxu3 %v3151_v25  ;;  %v3210_v25 = vld [vmem:[#allocation5 + $0x5a8] sm:$0xff] }
  0x84   :  { %1850 = vmatpush.bf16.msrb.mxu0 %v3126_v26  ;;  %v3218_v26 = vld [vmem:[#allocation5 + $0x5e8] sm:$0xff] }
  0x85   :  { %1863 = vmatpush.bf16.msrb.mxu1 %v3134_v27 }
  0x86   :  { %1876 = vmatpush.bf16.msrb.mxu2 %v3142_v28  ;;  %v3193_v28 = vld [vmem:[#allocation5 + $0x520] sm:$0xff] }
  0x87   :  { %1889 = vmatpush.bf16.msrb.mxu3 %v3150_v29  ;;  %v3201_v29 = vld [vmem:[#allocation5 + $0x560] sm:$0xff] }
  0x88   :  { %1851 = vmatpush.bf16.msrb.mxu0 %v3125_v30 }
  0x89   :  { %1864 = vmatpush.bf16.msrb.mxu1 %v3133_v31 }
  0x8a   :  { %1877 = vmatpush.bf16.msrb.mxu2 %v3141_v32  ;;  %v3209_v32 = vld [vmem:[#allocation5 + $0x5a0] sm:$0xff] }
  0x8b   :  { %1890 = vmatpush.bf16.msrb.mxu3 %v3149_v33  ;;  %1852 = vmatmul.bf16.vlgmr.msrb.gmra.mxu0 %v136_v38  ;;  %v3217_v33 = vld [vmem:[#allocation5 + $0x5e0] sm:$0xff]  ;;  %v3216_v38 = vld [vmem:[#allocation5 + $0x5d8] sm:$0xff] }
  0x8c   :  { %1896 = vmatpush.bf16.msra.mxu0 %v3164_v34  ;;  %1865 = vmatmul.bf16.vlgmr.msrb.gmra.mxu1 %v137_v40 }
  0x8d   :  { %1909 = vmatpush.bf16.msra.mxu1 %v3172_v35  ;;  %1878 = vmatmul.bf16.vlgmr.msrb.gmra.mxu2 %v138_v39  ;;  %v3192_v35 = vld [vmem:[#allocation5 + $0x518] sm:$0xff] }
  0x8e   :  { %1922 = vmatpush.bf16.msra.mxu2 %v3180_v36  ;;  %1891 = vmatmul.bf16.vlgmr.msrb.gmra.mxu3 %v139_v41  ;;  %v3200_v36 = vld [vmem:[#allocation5 + $0x558] sm:$0xff] }
  0x8f   :  { %1935 = vmatpush.bf16.msra.mxu3 %v3188_v37  ;;  %v3208_v37 = vld [vmem:[#allocation5 + $0x598] sm:$0xff] }
  0x90   :  { %1897 = vmatpush.bf16.msra.mxu0 %v3163_v42 }
  0x91   :  { %1910 = vmatpush.bf16.msra.mxu1 %v3171_v43  ;;  %v3191_v43 = vld [vmem:[#allocation5 + $0x510] sm:$0xff] }
  0x92   :  { %1923 = vmatpush.bf16.msra.mxu2 %v3179_v44  ;;  %v3199_v44 = vld [vmem:[#allocation5 + $0x550] sm:$0xff] }
  0x93   :  { %1936 = vmatpush.bf16.msra.mxu3 %v3187_v45 }
  0x94   :  { %1898 = vmatpush.bf16.msra.mxu0 %v3162_v46 }
  0x95   :  { %1911 = vmatpush.bf16.msra.mxu1 %v3170_v47  ;;  %v3207_v47 = vld [vmem:[#allocation5 + $0x590] sm:$0xff] }
  0x96   :  { %1924 = vmatpush.bf16.msra.mxu2 %v3178_v48  ;;  %v3215_v48 = vld [vmem:[#allocation5 + $0x5d0] sm:$0xff] }
  0x97   :  { %1937 = vmatpush.bf16.msra.mxu3 %v3186_v49  ;;  %v3190_v49 = vld [vmem:[#allocation5 + $0x508] sm:$0xff] }
  0x98   :  { %1899 = vmatpush.bf16.msra.mxu0 %v3161_v50  ;;  %v3198_v50 = vld [vmem:[#allocation5 + $0x548] sm:$0xff] }
  0x99   :  { %1912 = vmatpush.bf16.msra.mxu1 %v3169_v51  ;;  %v3206_v51 = vld [vmem:[#allocation5 + $0x588] sm:$0xff] }
  0x9a   :  { %1925 = vmatpush.bf16.msra.mxu2 %v3177_v52  ;;  %v3214_v52 = vld [vmem:[#allocation5 + $0x5c8] sm:$0xff] }
  0x9b   :  { %1938 = vmatpush.bf16.msra.mxu3 %v3185_v53 }
  0x9c   :  { %1900 = vmatpush.bf16.msra.mxu0 %v3160_v54  ;;  %v3189_v54 = vld [vmem:[#allocation5 + $0x500] sm:$0xff] }
  0x9d   :  { %1913 = vmatpush.bf16.msra.mxu1 %v3168_v55 }
  0x9e   :  { %1926 = vmatpush.bf16.msra.mxu2 %v3176_v56  ;;  %v3197_v56 = vld [vmem:[#allocation5 + $0x540] sm:$0xff] }
  0x9f   :  { %1939 = vmatpush.bf16.msra.mxu3 %v3184_v57  ;;  %v3205_v57 = vld [vmem:[#allocation5 + $0x580] sm:$0xff] }
  0xa0   :  { %1901 = vmatpush.bf16.msra.mxu0 %v3159_v58  ;;  %v3213_v58 = vld [vmem:[#allocation5 + $0x5c0] sm:$0xff] }
  0xa1   :  { %1914 = vmatpush.bf16.msra.mxu1 %v3167_v59  ;;  %v96_v59 = vld.sshfl [vmem:[#allocation1 + $0x20] sm:$0xff pattern:$0x73625140] }
  0xa2   :  { %1927 = vmatpush.bf16.msra.mxu2 %v3175_v60  ;;  %v97_v60 = vld.sshfl [vmem:[#allocation1 + $0x28] sm:$0xff pattern:$0x73625140] }
  0xa3   :  { %1940 = vmatpush.bf16.msra.mxu3 %v3183_v61  ;;  %v98_v61 = vld.sshfl [vmem:[#allocation1 + $0x30] sm:$0xff pattern:$0x73625140] }
  0xa4   :  { %1902 = vmatpush.bf16.msra.mxu0 %v3158_v62  ;;  %v99_v62 = vld.sshfl [vmem:[#allocation1 + $0x38] sm:$0xff pattern:$0x73625140] }
  0xa5   :  { %1915 = vmatpush.bf16.msra.mxu1 %v3166_v63  ;;  %v144_v63 = vpack.c.bf16 %v96_v59, %v96_v59 }
  0xa6   :  { %1928 = vmatpush.bf16.msra.mxu2 %v3174_v0  ;;  %v145_v0 = vpack.c.bf16 %v97_v60, %v97_v60  ;;  %v3233_v60 = vld [vmem:[%s3494_s5 + $0x20] sm:$0xff] }
  0xa7   :  { %1941 = vmatpush.bf16.msra.mxu3 %v3182_v1  ;;  %v146_v1 = vpack.c.bf16 %v98_v61, %v98_v61 }
  0xa8   :  { %1903 = vmatpush.bf16.msra.mxu0 %v3157_v2  ;;  %v1697_v27 = vpop.f32.mrf.mxu0  ;;  %v147_v2 = vpack.c.bf16 %v99_v62, %v99_v62  ;;  %v3232_v62 = vld [vmem:[%s3494_s5 + $0x18] sm:$0xff] }
  0xa9   :  { %1916 = vmatpush.bf16.msra.mxu1 %v3165_v3  ;;  %v1698_v30 = vadd.f32 %v3242_v24, %v1697_v27  ;;  %v1710_v31 = vpop.f32.mrf.mxu1 }
  0xaa   :  { %1929 = vmatpush.bf16.msra.mxu2 %v3173_v4 }
  0xab   :  { %1942 = vmatpush.bf16.msra.mxu3 %v3181_v5  ;;  %1904 = vmatmul.bf16.vlgmr.msra.gmra.mxu0 %v140_v14  ;;  %v1711_v34 = vadd.f32 %v1710_v31, %v1698_v30  ;;  %v3228_v31 = vld [vmem:[%s3492_s3 + $0x38] sm:$0xff] }
  0xac   :  { %1948 = vmatpush.bf16.msrb.mxu0 %v3196_v6  ;;  %1917 = vmatmul.bf16.vlgmr.msra.gmra.mxu1 %v141_v16 }
  0xad   :  { %1961 = vmatpush.bf16.msrb.mxu1 %v3204_v7  ;;  %1930 = vmatmul.bf16.vlgmr.msra.gmra.mxu2 %v142_v15 }
  0xae   :  { %1974 = vmatpush.bf16.msrb.mxu2 %v3212_v12  ;;  %1943 = vmatmul.bf16.vlgmr.msra.gmra.mxu3 %v143_v17 }
  0xaf   :  { %1987 = vmatpush.bf16.msrb.mxu3 %v3220_v13 }
  0xb0   :  { %1949 = vmatpush.bf16.msrb.mxu0 %v3195_v18  ;;  %v1723_v39 = vpop.f32.mrf.mxu2  ;;  %v1699_v42 = vpop.f32.mrf.mxu0 }
  0xb1   :  { %1962 = vmatpush.bf16.msrb.mxu1 %v3203_v19  ;;  %v1724_v40 = vadd.f32 %v1723_v39, %v1711_v34  ;;  %v1736_v41 = vpop.f32.mrf.mxu3  ;;  %v1712_v46 = vpop.f32.mrf.mxu1  ;;  %v3227_v34 = vld [vmem:[%s3492_s3 + $0x30] sm:$0xff]  ;;  %v3224_v39 = vld [vmem:[%s3492_s3 + $0x18] sm:$0xff] }
  0xb2   :  { %1975 = vmatpush.bf16.msrb.mxu2 %v3211_v20 }
  0xb3   :  { %1988 = vmatpush.bf16.msrb.mxu3 %v3219_v21  ;;  %v1737_v45 = vadd.f32 %v1736_v41, %v1724_v40  ;;  %v3223_v41 = vld [vmem:[%s3492_s3 + $0x10] sm:$0xff] }
  0xb4   :  { %1950 = vmatpush.bf16.msrb.mxu0 %v3194_v22 }
  0xb5   :  { %1963 = vmatpush.bf16.msrb.mxu1 %v3202_v23 }
  0xb6   :  { %1976 = vmatpush.bf16.msrb.mxu2 %v3210_v25 }
  0xb7   :  { %1989 = vmatpush.bf16.msrb.mxu3 %v3218_v26 }
  0xb8   :  { %1951 = vmatpush.bf16.msrb.mxu0 %v3193_v28  ;;  %v1725_v53 = vpop.f32.mrf.mxu2 }
  0xb9   :  { %1964 = vmatpush.bf16.msrb.mxu1 %v3201_v29  ;;  %v1738_v55 = vpop.f32.mrf.mxu3 }
  0xba   :  { %1977 = vmatpush.bf16.msrb.mxu2 %v3209_v32  ;;  %v3235_v55 = vld [vmem:[%s3494_s5 + $0x30] sm:$0xff] }
  0xbb   :  { %1990 = vmatpush.bf16.msrb.mxu3 %v3217_v33 }
  0xbc   :  { %1952 = vmatpush.bf16.msrb.mxu0 %v3192_v35  ;;  %v3226_v35 = vld [vmem:[%s3492_s3 + $0x28] sm:$0xff] }
  0xbd   :  { %1965 = vmatpush.bf16.msrb.mxu1 %v3200_v36 }
  0xbe   :  { %1978 = vmatpush.bf16.msrb.mxu2 %v3208_v37 }
  0xbf   :  { %1991 = vmatpush.bf16.msrb.mxu3 %v3216_v38  ;;  %v3225_v38 = vld [vmem:[%s3492_s3 + $0x20] sm:$0xff] }
  0xc0   :  { %1953 = vmatpush.bf16.msrb.mxu0 %v3191_v43  ;;  %v3222_v43 = vld [vmem:[%s3492_s3 + $0x8] sm:$0xff] }
  0xc1   :  { %1966 = vmatpush.bf16.msrb.mxu1 %v3199_v44 }
  0xc2   :  { %1979 = vmatpush.bf16.msrb.mxu2 %v3207_v47 }
  0xc3   :  { %1992 = vmatpush.bf16.msrb.mxu3 %v3215_v48  ;;  %v3221_v48 = vld [vmem:[%s3492_s3] sm:$0xff] }
  0xc4   :  { %1954 = vmatpush.bf16.msrb.mxu0 %v3190_v49 }
  0xc5   :  { %1967 = vmatpush.bf16.msrb.mxu1 %v3198_v50 }
  0xc6   :  { %1980 = vmatpush.bf16.msrb.mxu2 %v3206_v51 }
  0xc7   :  { %1993 = vmatpush.bf16.msrb.mxu3 %v3214_v52  ;;  %v3236_v52 = vld [vmem:[%s3494_s5 + $0x38] sm:$0xff] }
  0xc8   :  { %1955 = vmatpush.bf16.msrb.mxu0 %v3189_v54  ;;  %v1749_v3 = vpop.f32.mrf.mxu0 }
  0xc9   :  { %1968 = vmatpush.bf16.msrb.mxu1 %v3197_v56  ;;  %v1750_v4 = vadd.f32 %v1749_v3, %v1737_v45  ;;  %v1762_v5 = vpop.f32.mrf.mxu1  ;;  %v3231_v3 = vld [vmem:[%s3494_s5 + $0x10] sm:$0xff] }
  0xca   :  { %1981 = vmatpush.bf16.msrb.mxu2 %v3205_v57 }
  0xcb   :  { %1994 = vmatpush.bf16.msrb.mxu3 %v3213_v58  ;;  %1956 = vmatmul.bf16.vlgmr.msrb.gmra.mxu0 %v144_v63  ;;  %v1763_v6 = vadd.f32 %v1762_v5, %v1750_v4  ;;  %v3234_v58 = vld [vmem:[%s3494_s5 + $0x28] sm:$0xff] }
  0xcc   :  { %1969 = vmatmul.bf16.vlgmr.msrb.gmra.mxu1 %v145_v0  ;;  %2070 = vmatpush.bf16.msra.mxu0 %v3228_v31 }
  0xcd   :  { %1982 = vmatmul.bf16.vlgmr.msrb.gmra.mxu2 %v146_v1  ;;  %2153 = vmatpush.bf16.msra.mxu1 %v3236_v52 }
  0xce   :  { %1995 = vmatmul.bf16.vlgmr.msrb.gmra.mxu3 %v147_v2 }
  0xd0   :  { %v1775_v7 = vpop.f32.mrf.mxu2  ;;  %v1751_v10 = vpop.f32.mrf.mxu0  ;;  %2071 = vmatpush.bf16.msra.mxu0 %v3227_v34 }
  0xd1   :  { %v1776_v8 = vadd.f32 %v1775_v7, %v1763_v6  ;;  %v1788_v9 = vpop.f32.mrf.mxu3  ;;  %v1764_v12 = vpop.f32.mrf.mxu1  ;;  %2154 = vmatpush.bf16.msra.mxu1 %v3235_v55 }
  0xd3   :  { %v1789_v11 = vadd.f32 %v1788_v9, %v1776_v8 }
  0xd4   :  { %2072 = vmatpush.bf16.msra.mxu0 %v3226_v35 }
  0xd5   :  { %2155 = vmatpush.bf16.msra.mxu1 %v3234_v58 }
  0xd8   :  { %v1777_v13 = vpop.f32.mrf.mxu2  ;;  %2073 = vmatpush.bf16.msra.mxu0 %v3225_v38 }
  0xd9   :  { %v1790_v14 = vpop.f32.mrf.mxu3  ;;  %2156 = vmatpush.bf16.msra.mxu1 %v3233_v60 }
  0xdc   :  { %2074 = vmatpush.bf16.msra.mxu0 %v3224_v39 }
  0xdd   :  { %2157 = vmatpush.bf16.msra.mxu1 %v3232_v62 }
  0xe0   :  { %2075 = vmatpush.bf16.msra.mxu0 %v3223_v41 }
  0xe1   :  { %2158 = vmatpush.bf16.msra.mxu1 %v3231_v3 }
  0xe4   :  { %2076 = vmatpush.bf16.msra.mxu0 %v3222_v43 }
  0xe8   :  { %v1801_v15 = vpop.f32.mrf.mxu0  ;;  %2077 = vmatpush.bf16.msra.mxu0 %v3221_v48 }
  0xe9   :  { %v1802_v16 = vadd.f32 %v1801_v15, %v1789_v11  ;;  %v1814_v17 = vpop.f32.mrf.mxu1  ;;  %v3230_v15 = vld [vmem:[%s3494_s5 + $0x8] sm:$0xff] }
  0xea   :  { %2159 = vmatpush.bf16.msra.mxu1 %v3230_v15 }
  0xeb   :  { %v1815_v18 = vadd.f32 %v1814_v17, %v1802_v16  ;;  %v3229_v16 = vld [vmem:[%s3494_s5] sm:$0xff] }
  0xec   :  { %v3243_v17 = vld [vmem:[%s3493_s4] ss:$0 sm:$0xff]  ;;  %s3331_s4 = smov [#allocation7]  }
  0xed   :  { %s2184_s5 = sshll.u32 %s3331_s4, 4  ;;  %s2185_s5 = int_to_ptr.vmem [resolvable:$true] %s2184_s5 }
  0xee   :  { %2160 = vmatpush.bf16.msra.mxu1 %v3229_v16 }
  0xf0   :  { %v1827_v19 = vpop.f32.mrf.mxu2  ;;  %v1803_v22 = vpop.f32.mrf.mxu0 }
  0xf1   :  { %v1828_v20 = vadd.f32 %v1827_v19, %v1815_v18  ;;  %v1840_v21 = vpop.f32.mrf.mxu3  ;;  %v1816_v24 = vpop.f32.mrf.mxu1 }
  0xf3   :  { %v1841_v23 = vadd.f32 %v1840_v21, %v1828_v20 }
  0xf8   :  { %v1829_v25 = vpop.f32.mrf.mxu2 }
  0xf9   :  { %v1842_v26 = vpop.f32.mrf.mxu3 }
 0x108   :  { %v1853_v27 = vpop.f32.mrf.mxu0 }
 0x109   :  { %v1866_v28 = vpop.f32.mrf.mxu1  ;;  %v1854_v45 = vadd.f32 %v1853_v27, %v1841_v23  ;;  %v3244_v23 = vld [vmem:[%s3495_s6] ss:$0 sm:$0xff] }
 0x10b   :  { %v1867_v50 = vadd.f32 %v1866_v28, %v1854_v45 }
 0x110   :  { %v1879_v29 = vpop.f32.mrf.mxu2  ;;  %v1855_v32 = vpop.f32.mrf.mxu0 }
 0x111   :  { %v1892_v30 = vpop.f32.mrf.mxu3  ;;  %v1868_v33 = vpop.f32.mrf.mxu1  ;;  %v1880_v51 = vadd.f32 %v1879_v29, %v1867_v50 }
 0x113   :  { %v1893_v56 = vadd.f32 %v1892_v30, %v1880_v51 }
 0x118   :  { %v1881_v36 = vpop.f32.mrf.mxu2 }
 0x119   :  { %v1894_v37 = vpop.f32.mrf.mxu3 }
 0x128   :  { %v1905_v40 = vpop.f32.mrf.mxu0 }
 0x129   :  { %v1918_v42 = vpop.f32.mrf.mxu1  ;;  %v1906_v57 = vadd.f32 %v1905_v40, %v1893_v56 }
 0x12b   :  { %v1919_v59 = vadd.f32 %v1918_v42, %v1906_v57 }
 0x130   :  { %v1931_v44 = vpop.f32.mrf.mxu2  ;;  %v1907_v47 = vpop.f32.mrf.mxu0 }
 0x131   :  { %v1944_v46 = vpop.f32.mrf.mxu3  ;;  %v1920_v49 = vpop.f32.mrf.mxu1  ;;  %v1932_v61 = vadd.f32 %v1931_v44, %v1919_v59 }
 0x133   :  { %v1945_v63 = vadd.f32 %v1944_v46, %v1932_v61 }
 0x138   :  { %v1933_v53 = vpop.f32.mrf.mxu2 }
 0x139   :  { %v1946_v54 = vpop.f32.mrf.mxu3 }
 0x148   :  { %v1957_v0 = vpop.f32.mrf.mxu0 }
 0x149   :  { %v1970_v1 = vpop.f32.mrf.mxu1  ;;  %v1958_v2 = vadd.f32 %v1957_v0, %v1945_v63 }
 0x14b   :  { %v1971_v4 = vadd.f32 %v1970_v1, %v1958_v2 }
 0x150   :  { %v1983_v5 = vpop.f32.mrf.mxu2  ;;  %v1959_v8 = vpop.f32.mrf.mxu0 }
 0x151   :  { %v1996_v6 = vpop.f32.mrf.mxu3  ;;  %v1984_v7 = vadd.f32 %v1983_v5, %v1971_v4  ;;  %v1972_v9 = vpop.f32.mrf.mxu1 }
 0x153   :  { %v1997_v10 = vadd.f32 %v1996_v6, %v1984_v7 }
 0x155   :  { %v2000_v11 = vmax.f32 %v1997_v10, 0.0 }
 0x157   :  { %v2001_v12 = vpack.c.bf16 %v2000_v11, %v2000_v11 }
 0x158   :  { %v1985_v13 = vpop.f32.mrf.mxu2 }
 0x159   :  { %v1998_v14 = vpop.f32.mrf.mxu3  ;;  %2078 = vmatmul.bf16.vlgmr.msra.gmra.mxu0 %v2001_v12 }
 0x1d6   :  { %v2079_v18 = vpop.f32.mrf.mxu0 }
 0x1d7   :  { %v2080_v19 = vadd.f32 %v3243_v17, %v2079_v18 }
 0x1d9   :  { %v2083_v20 = vmax.f32 %v2080_v19, 0.0 }
 0x1db   :  { %v2084_v21 = vpack.c.bf16 %v2083_v20, %v2083_v20 }
 0x1dd   :  { %2161 = vmatmul.bf16.vlgmr.msra.gmra.mxu1 %v2084_v21 }
 0x1de   :  { %v2081_v22 = vpop.f32.mrf.mxu0 }
 0x25a   :  { %v2162_v24 = vpop.f32.mrf.mxu1 }
 0x25b   :  { %v2163_v25 = vadd.f32 %v3244_v23, %v2162_v24 }
 0x25d   :  { %v2167_v26 = vsel %vm2166_vm0, %v2163_v25, -inf }
 0x25e   :  { %2168 = vmax.xlane.f32.xlu0 %v2167_v26 }
 0x262   :  { %v2164_v27 = vpop.f32.mrf.mxu1 }
 0x2d1   :  { %v2169_v28 = vpop.xlane.xlu0 %2168 }
 0x2d2   :  { %v2170_v29 = vsub.f32 %v2163_v25, %v2169_v28 }
 0x2d4   :  { %v2171_v30 = vmul.f32 1.442695, %v2170_v29 }
 0x2d6   :  { %3245 = vpow2.f32 %v2171_v30 }
 0x2dc   :  { %v3246_v31 = vpop.eup %3245 }
 0x2dd   :  { %v2173_v32 = vsel %vm2166_vm0, %v3246_v31, 0.0 }
 0x2de   :  { %2174 = vadd.xlane.f32.xlu0 %v2173_v32 }
 0x351   :  { %v2175_v33 = vpop.xlane.xlu0 %2174 }
 0x352   :  { %3247 = vrcp.f32 %v2175_v33 }
 0x358   :  { %v3248_v34 = vpop.eup %3247 }
 0x359   :  { %v2177_v35 = vmul.f32 %v3248_v34, %v3246_v31 }
 0x35b   :  { %2178 = vst.msk [vmem:[#allocation7] sm:$0x3] %vm2166_vm0, %v2177_v35 }
 0x35c   :  { %2189 = dma.vmem_to_hbm [thread:$0]  %s2185_s5, 32, %s2187_s22, [#allocation4]  }
 0x35d   :  { %3325 = dma.done.wait [#allocation4], 32  }
 0x35e   :  { %3326 = vsyncadd [#allocation4], 4294967264 }
 0x35f   :  { %2194 = vsyncpa [#allocation3], 1 }
 0x360   :  { %2195 = vsyncpa [#allocation6], 1 }
 0x361   :  { %2196 = vsyncpa [#allocation4], 1 }

</bundles_post_ra>
